<compile_context>
chip_gen: v6e
topology: v6e:2x2x1
jax: 0.10.0
libtpu: 0.0.40
codegen_flags: <defaults>
</compile_context>

<pallas_src>
import jax
import jax.numpy as jnp
import numpy as np
from jax import lax
from jax.experimental import pallas as pl
from jax.experimental.pallas import tpu as pltpu

# ---- synthetic hyper-parameters consistent with the torch module ----
VOCAB = 50
D_MODEL = 40                 # args.d_model (divisible by 10 and 5)
HIDDEN = D_MODEL // 10       # LSTM hidden size per direction = 4
SEQ = 8                      # args.max_words
BATCH = 2
N_CLASSES = 3
OUT_PAD = 128                # lane-dense padded output width (sliced back to 3 in wrapper)
DP = 128                     # lane-padded model-dim block width
GP = 128                     # lane-padded gate-block width (4*HIDDEN -> 128)
N_TOK = BATCH * SEQ
SCALE = 1.0 / (D_MODEL ** 0.5)
NEG_INF = -1e30


def attention_lstm_kernel(ids_ref, emb_ref, wqkv_ref, bqkv_ref, amask_ref,
                          wih_ref, bih_ref, whh_ref, pmf_ref, pmb_ref,
                          wf_ref, wb_ref, bfc_ref, out_ref):
    h = HIDDEN

    # ---- embedding gather fused as a one-hot MXU matmul ----
    # NOTE: out-of-range token ids silently map to a zero embedding row (torch.nn.Embedding
    # would fault); fine for the in-range synthetic inputs used here.
    ids = ids_ref[...]                                                    # (N_TOK, 1) int32
    onehot = (lax.broadcasted_iota(jnp.int32, (N_TOK, VOCAB), 1) == ids).astype(jnp.float32)
    x = jnp.dot(onehot, emb_ref[...], preferred_element_type=jnp.float32)          # (16, 40)

    # ---- fused q|k|v projection; blocks lane-aligned at offsets 0 / 128 / 256 ----
    qkv = jnp.dot(x, wqkv_ref[...], preferred_element_type=jnp.float32) + bqkv_ref[...]   # (16, 384)
    q = qkv[:, 0:DP]
    k = qkv[:, DP:2 * DP]
    v = qkv[:, 2 * DP:3 * DP]

    # ---- block-diagonal attention over both batch rows at once (exact softmax) ----
    s_mat = lax.dot_general(q, k, (((1,), (1,)), ((), ())),
                            preferred_element_type=jnp.float32) * SCALE            # (16, 16)
    s_mat = s_mat + amask_ref[...]            # additive mask: 0 in-batch, -1e30 cross-batch
    s_mat = s_mat - jnp.max(s_mat, axis=-1, keepdims=True)
    p = jnp.exp(s_mat)
    p = p / jnp.sum(p, axis=-1, keepdims=True)
    a = jnp.maximum(jnp.dot(p, v, preferred_element_type=jnp.float32), 0.0)         # (16, 128)
    # TODO(synk): dropout implemented as identity (module evaluated with training=False).

    # ---- LSTM input projection for both directions, then permute rows into per-step chain
    #      stacks: gstack row 4*s + c = gate pre-activation of chain c at unrolled step s,
    #      chains = (fwd b0, fwd b1, bwd b0, bwd b1); bwd chains consume time SEQ-1-s. ----
    gx = jnp.dot(a, wih_ref[...], preferred_element_type=jnp.float32) + bih_ref[...]     # (16, 256)
    gstack = (jnp.dot(pmf_ref[...], gx[:, 0:GP], preferred_element_type=jnp.float32) +
              jnp.dot(pmb_ref[...], gx[:, GP:2 * GP], preferred_element_type=jnp.float32))  # (32, 128)

    # recurrent weight rows stacked per chain: whh_ref[4*j + c] = Whh_{dir(c)}[j]
    whh_rows = [whh_ref[4 * j:4 * j + 4, :] for j in range(h)]            # each (4, 4H)

    hp = jnp.zeros((4, h), jnp.float32)        # stacked hidden states, one chain per sublane
    cp = jnp.zeros((4, h), jnp.float32)
    acc = jnp.zeros((BATCH, OUT_PAD), jnp.float32)   # incremental fc accumulator

    for s in range(SEQ):                       # fully unrolled; SEQ is compile-time constant
        g_in = gstack[4 * s:4 * s + 4, 0:4 * h]                           # (4, 4H)
        # recurrence hp @ Whh on the VPU as a 4-term broadcast-FMA chain
        rec = hp[:, 0:1] * whh_rows[0]
        for j in range(1, h):
            rec = rec + hp[:, j:j + 1] * whh_rows[j]
        gates = g_in + rec                                                # (4, 4H)
        sg = jax.nn.sigmoid(gates)             # one EUP push serves all 4 chains
        th = jnp.tanh(gates)
        i_g = sg[:, 0:h]                       # torch gate order: i, f, g, o
        f_g = sg[:, h:2 * h]
        g_g = th[:, 2 * h:3 * h]
        o_g = sg[:, 3 * h:4 * h]
        cp = f_g * cp + i_g * g_g
        hp = o_g * jnp.tanh(cp)
        # incremental fc: relu(h) hits the output through step-reordered fc weight rows,
        # so no per-step hidden state stays live past this iteration.
        hr = jnp.maximum(hp, 0.0)
        acc = acc + jnp.dot(hr[0:2, :], wf_ref[4 * s:4 * s + 4, :],
                            preferred_element_type=jnp.float32)           # fwd chains, time s
        acc = acc + jnp.dot(hr[2:4, :], wb_ref[4 * s:4 * s + 4, :],
                            preferred_element_type=jnp.float32)           # bwd chains, time SEQ-1-s

    out_ref[...] = acc + bfc_ref[...]                                     # single (2, 128) store


def prepare_params(p):
    """One-time host-side weight fusion / padding / reordering (kept out of the jitted path)."""
    h = HIDDEN
    g = 4 * h

    def pad_cols(w, width):
        return jnp.zeros((w.shape[0], width), jnp.float32).at[:, :w.shape[1]].set(w)

    def pad_rows(w, rows):
        return jnp.zeros((rows, w.shape[1]), jnp.float32).at[:w.shape[0], :].set(w)

    # fused q|k|v, each block padded to a 128-lane boundary -> (40, 384) / (1, 384)
    wqkv = jnp.concatenate([pad_cols(p["wq"], DP), pad_cols(p["wk"], DP), pad_cols(p["wv"], DP)], axis=1)
    bqkv = jnp.concatenate([pad_cols(p["bq"], DP), pad_cols(p["bk"], DP), pad_cols(p["bv"], DP)], axis=1)

    # additive block-diagonal attention mask for (seq-major, batch-minor) token order
    tok_b = np.arange(N_TOK) % BATCH
    amask = jnp.asarray(np.where(tok_b[:, None] == tok_b[None, :], 0.0, NEG_INF).astype(np.float32))

    # fused fwd|bwd LSTM input projection: input rows padded to the 128-lane attention output,
    # gate blocks padded to 128-lane boundaries -> (128, 256) / (1, 256)
    wih = jnp.concatenate([pad_cols(pad_rows(p["wih_f"], DP), GP),
                           pad_cols(pad_rows(p["wih_b"], DP), GP)], axis=1)
    bih = jnp.concatenate([pad_cols(p["bf"], GP), pad_cols(p["bb"], GP)], axis=1)

    # recurrent weights stacked per chain: row 4*j + c = Whh_{fwd,fwd,bwd,bwd}[c][j]  -> (16, 16)
    whh_st = jnp.stack([p["whh_f"], p["whh_f"], p["whh_b"], p["whh_b"]], axis=1).reshape(4 * h, g)

    # one-hot permutations mapping gx rows (token n = s*BATCH + b) onto the per-step chain stack
    pmf = np.zeros((4 * SEQ, N_TOK), np.float32)
    pmb = np.zeros((4 * SEQ, N_TOK), np.float32)
    for s in range(SEQ):
        t = SEQ - 1 - s
        for b in range(BATCH):
            pmf[4 * s + b, BATCH * s + b] = 1.0          # fwd chains read time s
            pmb[4 * s + 2 + b, BATCH * t + b] = 1.0      # bwd chains read time SEQ-1-s
    pmf = jnp.asarray(pmf)
    pmb = jnp.asarray(pmb)

    # fc weight rows reordered so unrolled step s uses rows [4s:4s+4], padded to 128 lanes.
    # torch reshape order: original fc row for (time, dir, j) = time*2H + dir*H + j.
    idx_f = np.array([s * 2 * h + j for s in range(SEQ) for j in range(h)])
    idx_b = np.array([(SEQ - 1 - s) * 2 * h + h + j for s in range(SEQ) for j in range(h)])
    wf_re = pad_cols(p["wfc"][idx_f, :], OUT_PAD)        # (32, 128)
    wb_re = pad_cols(p["wfc"][idx_b, :], OUT_PAD)        # (32, 128)
    bfc = pad_cols(p["bfc"], OUT_PAD)                    # (1, 128)

    return (p["emb"], wqkv, bqkv, amask, wih, bih, whh_st, pmf, pmb, wf_re, wb_re, bfc)


@jax.jit
def attention_forward(x_ids, prep):
    # tokens reordered to (seq-major, batch-minor): row n = s*BATCH + b
    ids2d = x_ids.astype(jnp.int32).T.reshape(N_TOK, 1)
    args = (ids2d,) + tuple(prep)

    def full_spec(a):
        nd = a.ndim
        return pl.BlockSpec(a.shape, lambda i, _n=nd: (0,) * _n)

    out = pl.pallas_call(
        attention_lstm_kernel,
        out_shape=jax.ShapeDtypeStruct((BATCH, OUT_PAD), jnp.float32),
        grid_spec=pltpu.PrefetchScalarGridSpec(
            num_scalar_prefetch=0,
            grid=(1,),                      # whole batch in a single kernel invocation
            in_specs=[full_spec(a) for a in args],
            out_specs=pl.BlockSpec((BATCH, OUT_PAD), lambda i: (0, 0)),
        ),
        compiler_params=pltpu.CompilerParams(dimension_semantics=("arbitrary",)),
    )(*args)
    return out[:, :N_CLASSES]


# ---------------- pure-JAX reference (for correctness check) ----------------
def reference_forward(x_ids, params):
    x = params["emb"][x_ids]
    q = x @ params["wq"] + params["bq"]
    k = x @ params["wk"] + params["bk"]
    v = x @ params["wv"] + params["bv"]
    w = jnp.einsum("bqd,bkd->bqk", q, k) / (x.shape[-1] ** 0.5)
    w = jax.nn.softmax(w, axis=2)
    a = jnp.maximum(jnp.einsum("bqk,bkd->bqd", w, v), 0.0)

    def lstm_dir(a, wih, whh, bias, reverse):
        gx = a @ wih + bias
        if reverse:
            gx = gx[:, ::-1, :]
        bsz = a.shape[0]
        h0 = jnp.zeros((bsz, HIDDEN)); c0 = jnp.zeros((bsz, HIDDEN))

        def step(carry, g):
            hp, cp = carry
            gates = g + hp @ whh
            i_g = jax.nn.sigmoid(gates[:, :HIDDEN])
            f_g = jax.nn.sigmoid(gates[:, HIDDEN:2 * HIDDEN])
            g_g = jnp.tanh(gates[:, 2 * HIDDEN:3 * HIDDEN])
            o_g = jax.nn.sigmoid(gates[:, 3 * HIDDEN:])
            cn = f_g * cp + i_g * g_g
            hn = o_g * jnp.tanh(cn)
            return (hn, cn), hn

        _, hs = lax.scan(step, (h0, c0), jnp.swapaxes(gx, 0, 1))
        hs = jnp.swapaxes(hs, 0, 1)
        if reverse:
            hs = hs[:, ::-1, :]
        return hs

    hf = lstm_dir(a, params["wih_f"], params["whh_f"], params["bf"], False)
    hb = lstm_dir(a, params["wih_b"], params["whh_b"], params["bb"], True)
    hs = jnp.maximum(jnp.concatenate([hf, hb], axis=-1), 0.0)
    flat = hs.reshape(hs.shape[0], -1)
    return flat @ params["wfc"] + params["bfc"]


def init_params(key):
    ks = jax.random.split(key, 15)
    nrm = lambda k, shape: jax.random.normal(k, shape, jnp.float32) * 0.1
    return dict(
        emb=nrm(ks[0], (VOCAB, D_MODEL)),
        wq=nrm(ks[1], (D_MODEL, D_MODEL)), bq=nrm(ks[2], (1, D_MODEL)),
        wk=nrm(ks[3], (D_MODEL, D_MODEL)), bk=nrm(ks[4], (1, D_MODEL)),
        wv=nrm(ks[5], (D_MODEL, D_MODEL)), bv=nrm(ks[6], (1, D_MODEL)),
        wih_f=nrm(ks[7], (D_MODEL, 4 * HIDDEN)),
        whh_f=nrm(ks[8], (HIDDEN, 4 * HIDDEN)),
        bf=nrm(ks[9], (1, 4 * HIDDEN)),
        wih_b=nrm(ks[10], (D_MODEL, 4 * HIDDEN)),
        whh_b=nrm(ks[11], (HIDDEN, 4 * HIDDEN)),
        bb=nrm(ks[12], (1, 4 * HIDDEN)),
        wfc=nrm(ks[13], (2 * HIDDEN * SEQ, N_CLASSES)),
        bfc=nrm(ks[14], (1, N_CLASSES)),
    )


if __name__ == "__main__":
    key = jax.random.PRNGKey(0)
    kp, kx = jax.random.split(key)
    params = init_params(kp)
    x_ids = jax.random.randint(kx, (BATCH, SEQ), 0, VOCAB, dtype=jnp.int32)

    prep = prepare_params(params)              # one-time weight fusion, outside the jitted path
    out = attention_forward(x_ids, prep)
    out = jax.block_until_ready(out)

    ref = reference_forward(x_ids, params)
    np.testing.assert_allclose(np.asarray(out), np.asarray(ref), rtol=1e-3, atol=1e-4)
    print("KERNEL_OK")
</pallas_src>

<mosaic_0001>
module attributes {stable_mosaic.version = 11 : i64} {
  func.func @attention_lstm_kernel(%arg0: i32, %arg1: memref<16x1xi32, #tpu.memory_space<vmem>>, %arg2: memref<50x40xf32, #tpu.memory_space<vmem>>, %arg3: memref<40x384xf32, #tpu.memory_space<vmem>>, %arg4: memref<1x384xf32, #tpu.memory_space<vmem>>, %arg5: memref<16x16xf32, #tpu.memory_space<vmem>>, %arg6: memref<128x256xf32, #tpu.memory_space<vmem>>, %arg7: memref<1x256xf32, #tpu.memory_space<vmem>>, %arg8: memref<16x16xf32, #tpu.memory_space<vmem>>, %arg9: memref<32x16xf32, #tpu.memory_space<vmem>>, %arg10: memref<32x16xf32, #tpu.memory_space<vmem>>, %arg11: memref<32x128xf32, #tpu.memory_space<vmem>>, %arg12: memref<32x128xf32, #tpu.memory_space<vmem>>, %arg13: memref<1x128xf32, #tpu.memory_space<vmem>>, %arg14: memref<2x128xf32, #tpu.memory_space<vmem>>) attributes {dimension_semantics = [#tpu.dimension_semantics<arbitrary>], iteration_bounds = array<i64: 1>, scalar_prefetch = 0 : i64, scratch_operands = 0 : i64, tpu.core_type = #tpu.core_type<tc>, window_params = [{pipeline_mode = #tpu.pipeline_mode<synchronous>, transform_indices = @transform_0, window_bounds = array<i64: 16, 1>}, {pipeline_mode = #tpu.pipeline_mode<synchronous>, transform_indices = @transform_1, window_bounds = array<i64: 50, 40>}, {pipeline_mode = #tpu.pipeline_mode<synchronous>, transform_indices = @transform_2, window_bounds = array<i64: 40, 384>}, {pipeline_mode = #tpu.pipeline_mode<synchronous>, transform_indices = @transform_3, window_bounds = array<i64: 1, 384>}, {pipeline_mode = #tpu.pipeline_mode<synchronous>, transform_indices = @transform_4, window_bounds = array<i64: 16, 16>}, {pipeline_mode = #tpu.pipeline_mode<synchronous>, transform_indices = @transform_5, window_bounds = array<i64: 128, 256>}, {pipeline_mode = #tpu.pipeline_mode<synchronous>, transform_indices = @transform_6, window_bounds = array<i64: 1, 256>}, {pipeline_mode = #tpu.pipeline_mode<synchronous>, transform_indices = @transform_7, window_bounds = array<i64: 16, 16>}, {pipeline_mode = #tpu.pipeline_mode<synchronous>, transform_indices = @transform_8, window_bounds = array<i64: 32, 16>}, {pipeline_mode = #tpu.pipeline_mode<synchronous>, transform_indices = @transform_9, window_bounds = array<i64: 32, 16>}, {pipeline_mode = #tpu.pipeline_mode<synchronous>, transform_indices = @transform_10, window_bounds = array<i64: 32, 128>}, {pipeline_mode = #tpu.pipeline_mode<synchronous>, transform_indices = @transform_11, window_bounds = array<i64: 32, 128>}, {pipeline_mode = #tpu.pipeline_mode<synchronous>, transform_indices = @transform_12, window_bounds = array<i64: 1, 128>}, {pipeline_mode = #tpu.pipeline_mode<synchronous>, transform_indices = @transform_13, window_bounds = array<i64: 2, 128>}]} {
    %c0 = arith.constant 0 : index
    %c0_0 = arith.constant 0 : index
    %0 = vector.load %arg1[%c0, %c0_0] : memref<16x1xi32, #tpu.memory_space<vmem>>, vector<16x1xi32>
    %1 = tpu.iota {dimensions = array<i32: 1>} : vector<16x50xi32>
    %2 = vector.broadcast %0 : vector<16x1xi32> to vector<16x50xi32>
    %3 = arith.cmpi eq, %1, %2 : vector<16x50xi32>
    %4 = arith.extui %3 : vector<16x50xi1> to vector<16x50xi32>
    %5 = arith.sitofp %4 : vector<16x50xi32> to vector<16x50xf32>
    %c0_1 = arith.constant 0 : index
    %c0_2 = arith.constant 0 : index
    %6 = vector.load %arg2[%c0_1, %c0_2] : memref<50x40xf32, #tpu.memory_space<vmem>>, vector<50x40xf32>
    %cst = arith.constant dense<0.000000e+00> : vector<16x40xf32>
    %7 = tpu.matmul %5, %6, %cst {dimension_numbers = #tpu.dot_dimension_numbers<[1], [0], [0], [1], [0, 0, 1, 1], [], []>} : vector<16x50xf32>, vector<50x40xf32>, vector<16x40xf32> -> vector<16x40xf32>
    %c0_3 = arith.constant 0 : index
    %c0_4 = arith.constant 0 : index
    %8 = vector.load %arg3[%c0_3, %c0_4] : memref<40x384xf32, #tpu.memory_space<vmem>>, vector<40x384xf32>
    %cst_5 = arith.constant dense<0.000000e+00> : vector<16x384xf32>
    %9 = tpu.matmul %7, %8, %cst_5 {dimension_numbers = #tpu.dot_dimension_numbers<[1], [0], [0], [1], [0, 0, 1, 1], [], []>} : vector<16x40xf32>, vector<40x384xf32>, vector<16x384xf32> -> vector<16x384xf32>
    %c0_6 = arith.constant 0 : index
    %c0_7 = arith.constant 0 : index
    %10 = vector.load %arg4[%c0_6, %c0_7] : memref<1x384xf32, #tpu.memory_space<vmem>>, vector<1x384xf32>
    %11 = vector.broadcast %10 : vector<1x384xf32> to vector<16x384xf32>
    %12 = arith.addf %9, %11 : vector<16x384xf32>
    %13 = vector.extract_strided_slice %12 {offsets = [0, 0], sizes = [16, 128], strides = [1, 1]} : vector<16x384xf32> to vector<16x128xf32>
    %14 = vector.extract_strided_slice %12 {offsets = [0, 128], sizes = [16, 128], strides = [1, 1]} : vector<16x384xf32> to vector<16x128xf32>
    %15 = vector.extract_strided_slice %12 {offsets = [0, 256], sizes = [16, 128], strides = [1, 1]} : vector<16x384xf32> to vector<16x128xf32>
    %cst_8 = arith.constant dense<0.000000e+00> : vector<16x16xf32>
    %16 = tpu.matmul %13, %14, %cst_8 {dimension_numbers = #tpu.dot_dimension_numbers<[1], [1], [0], [0], [0, 0, 1, 0], [], []>} : vector<16x128xf32>, vector<16x128xf32>, vector<16x16xf32> -> vector<16x16xf32>
    %cst_9 = arith.constant 0.158113882 : f32
    %17 = vector.broadcast %cst_9 : f32 to vector<16x16xf32>
    %18 = arith.mulf %16, %17 : vector<16x16xf32>
    %c0_10 = arith.constant 0 : index
    %c0_11 = arith.constant 0 : index
    %19 = vector.load %arg5[%c0_10, %c0_11] : memref<16x16xf32, #tpu.memory_space<vmem>>, vector<16x16xf32>
    %20 = arith.addf %18, %19 : vector<16x16xf32>
    %cst_12 = arith.constant dense<0xFF800000> : vector<16xf32>
    %21 = vector.multi_reduction <maximumf>, %20, %cst_12 [1] : vector<16x16xf32> to vector<16xf32>
    %22 = vector.shape_cast %21 : vector<16xf32> to vector<16x1xf32>
    %23 = vector.broadcast %22 : vector<16x1xf32> to vector<16x16xf32>
    %24 = arith.subf %20, %23 : vector<16x16xf32>
    %25 = math.exp %24 : vector<16x16xf32>
    %cst_13 = arith.constant dense<0.000000e+00> : vector<16xf32>
    %26 = vector.multi_reduction <add>, %25, %cst_13 [1] : vector<16x16xf32> to vector<16xf32>
    %27 = vector.shape_cast %26 : vector<16xf32> to vector<16x1xf32>
    %28 = vector.broadcast %27 : vector<16x1xf32> to vector<16x16xf32>
    %29 = arith.divf %25, %28 : vector<16x16xf32>
    %cst_14 = arith.constant dense<0.000000e+00> : vector<16x128xf32>
    %30 = tpu.matmul %29, %15, %cst_14 {dimension_numbers = #tpu.dot_dimension_numbers<[1], [0], [0], [1], [0, 0, 1, 1], [], []>} : vector<16x16xf32>, vector<16x128xf32>, vector<16x128xf32> -> vector<16x128xf32>
    %cst_15 = arith.constant 0.000000e+00 : f32
    %31 = vector.broadcast %cst_15 : f32 to vector<16x128xf32>
    %32 = arith.maximumf %30, %31 : vector<16x128xf32>
    %c0_16 = arith.constant 0 : index
    %c0_17 = arith.constant 0 : index
    %33 = vector.load %arg6[%c0_16, %c0_17] : memref<128x256xf32, #tpu.memory_space<vmem>>, vector<128x256xf32>
    %cst_18 = arith.constant dense<0.000000e+00> : vector<16x256xf32>
    %34 = tpu.matmul %32, %33, %cst_18 {dimension_numbers = #tpu.dot_dimension_numbers<[1], [0], [0], [1], [0, 0, 1, 1], [], []>} : vector<16x128xf32>, vector<128x256xf32>, vector<16x256xf32> -> vector<16x256xf32>
    %c0_19 = arith.constant 0 : index
    %c0_20 = arith.constant 0 : index
    %35 = vector.load %arg7[%c0_19, %c0_20] : memref<1x256xf32, #tpu.memory_space<vmem>>, vector<1x256xf32>
    %36 = vector.broadcast %35 : vector<1x256xf32> to vector<16x256xf32>
    %37 = arith.addf %34, %36 : vector<16x256xf32>
    %c0_21 = arith.constant 0 : index
    %c0_22 = arith.constant 0 : index
    %38 = vector.load %arg9[%c0_21, %c0_22] : memref<32x16xf32, #tpu.memory_space<vmem>>, vector<32x16xf32>
    %39 = vector.extract_strided_slice %37 {offsets = [0, 0], sizes = [16, 128], strides = [1, 1]} : vector<16x256xf32> to vector<16x128xf32>
    %cst_23 = arith.constant dense<0.000000e+00> : vector<32x128xf32>
    %40 = tpu.matmul %38, %39, %cst_23 {dimension_numbers = #tpu.dot_dimension_numbers<[1], [0], [0], [1], [0, 0, 1, 1], [], []>} : vector<32x16xf32>, vector<16x128xf32>, vector<32x128xf32> -> vector<32x128xf32>
    %c0_24 = arith.constant 0 : index
    %c0_25 = arith.constant 0 : index
    %41 = vector.load %arg10[%c0_24, %c0_25] : memref<32x16xf32, #tpu.memory_space<vmem>>, vector<32x16xf32>
    %42 = vector.extract_strided_slice %37 {offsets = [0, 128], sizes = [16, 128], strides = [1, 1]} : vector<16x256xf32> to vector<16x128xf32>
    %cst_26 = arith.constant dense<0.000000e+00> : vector<32x128xf32>
    %43 = tpu.matmul %41, %42, %cst_26 {dimension_numbers = #tpu.dot_dimension_numbers<[1], [0], [0], [1], [0, 0, 1, 1], [], []>} : vector<32x16xf32>, vector<16x128xf32>, vector<32x128xf32> -> vector<32x128xf32>
    %44 = arith.addf %40, %43 : vector<32x128xf32>
    %c0_27 = arith.constant 0 : index
    %c0_28 = arith.constant 0 : index
    %45 = vector.load %arg8[%c0_27, %c0_28] : memref<16x16xf32, #tpu.memory_space<vmem>>, vector<4x16xf32>
    %c4 = arith.constant 4 : index
    %c0_29 = arith.constant 0 : index
    %46 = vector.load %arg8[%c4, %c0_29] : memref<16x16xf32, #tpu.memory_space<vmem>>, vector<4x16xf32>
    %c8 = arith.constant 8 : index
    %c0_30 = arith.constant 0 : index
    %47 = vector.load %arg8[%c8, %c0_30] : memref<16x16xf32, #tpu.memory_space<vmem>>, vector<4x16xf32>
    %c12 = arith.constant 12 : index
    %c0_31 = arith.constant 0 : index
    %48 = vector.load %arg8[%c12, %c0_31] : memref<16x16xf32, #tpu.memory_space<vmem>>, vector<4x16xf32>
    %cst_32 = arith.constant 0.000000e+00 : f32
    %49 = vector.broadcast %cst_32 : f32 to vector<4x4xf32>
    %cst_33 = arith.constant 0.000000e+00 : f32
    %50 = vector.broadcast %cst_33 : f32 to vector<4x4xf32>
    %cst_34 = arith.constant 0.000000e+00 : f32
    %51 = vector.broadcast %cst_34 : f32 to vector<2x128xf32>
    %52 = vector.extract_strided_slice %44 {offsets = [0, 0], sizes = [4, 16], strides = [1, 1]} : vector<32x128xf32> to vector<4x16xf32>
    %53 = vector.extract_strided_slice %49 {offsets = [0, 0], sizes = [4, 1], strides = [1, 1]} : vector<4x4xf32> to vector<4x1xf32>
    %54 = vector.broadcast %53 : vector<4x1xf32> to vector<4x16xf32>
    %55 = arith.mulf %54, %45 : vector<4x16xf32>
    %56 = vector.extract_strided_slice %49 {offsets = [0, 1], sizes = [4, 1], strides = [1, 1]} : vector<4x4xf32> to vector<4x1xf32>
    %57 = vector.broadcast %56 : vector<4x1xf32> to vector<4x16xf32>
    %58 = arith.mulf %57, %46 : vector<4x16xf32>
    %59 = arith.addf %55, %58 : vector<4x16xf32>
    %60 = vector.extract_strided_slice %49 {offsets = [0, 2], sizes = [4, 1], strides = [1, 1]} : vector<4x4xf32> to vector<4x1xf32>
    %61 = vector.broadcast %60 : vector<4x1xf32> to vector<4x16xf32>
    %62 = arith.mulf %61, %47 : vector<4x16xf32>
    %63 = arith.addf %59, %62 : vector<4x16xf32>
    %64 = vector.extract_strided_slice %49 {offsets = [0, 3], sizes = [4, 1], strides = [1, 1]} : vector<4x4xf32> to vector<4x1xf32>
    %65 = vector.broadcast %64 : vector<4x1xf32> to vector<4x16xf32>
    %66 = arith.mulf %65, %48 : vector<4x16xf32>
    %67 = arith.addf %63, %66 : vector<4x16xf32>
    %68 = arith.addf %52, %67 : vector<4x16xf32>
    %69 = arith.negf %68 : vector<4x16xf32>
    %70 = math.exp %69 : vector<4x16xf32>
    %cst_35 = arith.constant 1.000000e+00 : f32
    %71 = vector.broadcast %cst_35 : f32 to vector<4x16xf32>
    %72 = arith.addf %71, %70 : vector<4x16xf32>
    %73 = arith.divf %71, %72 : vector<4x16xf32>
    %74 = math.tanh %68 : vector<4x16xf32>
    %75 = vector.extract_strided_slice %73 {offsets = [0, 0], sizes = [4, 4], strides = [1, 1]} : vector<4x16xf32> to vector<4x4xf32>
    %76 = vector.extract_strided_slice %73 {offsets = [0, 4], sizes = [4, 4], strides = [1, 1]} : vector<4x16xf32> to vector<4x4xf32>
    %77 = vector.extract_strided_slice %74 {offsets = [0, 8], sizes = [4, 4], strides = [1, 1]} : vector<4x16xf32> to vector<4x4xf32>
    %78 = vector.extract_strided_slice %73 {offsets = [0, 12], sizes = [4, 4], strides = [1, 1]} : vector<4x16xf32> to vector<4x4xf32>
    %79 = arith.mulf %76, %50 : vector<4x4xf32>
    %80 = arith.mulf %75, %77 : vector<4x4xf32>
    %81 = arith.addf %79, %80 : vector<4x4xf32>
    %82 = math.tanh %81 : vector<4x4xf32>
    %83 = arith.mulf %78, %82 : vector<4x4xf32>
    %cst_36 = arith.constant 0.000000e+00 : f32
    %84 = vector.broadcast %cst_36 : f32 to vector<4x4xf32>
    %85 = arith.maximumf %83, %84 : vector<4x4xf32>
    %86 = vector.extract_strided_slice %85 {offsets = [0, 0], sizes = [2, 4], strides = [1, 1]} : vector<4x4xf32> to vector<2x4xf32>
    %c0_37 = arith.constant 0 : index
    %c0_38 = arith.constant 0 : index
    %87 = vector.load %arg11[%c0_37, %c0_38] : memref<32x128xf32, #tpu.memory_space<vmem>>, vector<4x128xf32>
    %cst_39 = arith.constant dense<0.000000e+00> : vector<2x128xf32>
    %88 = tpu.matmul %86, %87, %cst_39 {dimension_numbers = #tpu.dot_dimension_numbers<[1], [0], [0], [1], [0, 0, 1, 1], [], []>} : vector<2x4xf32>, vector<4x128xf32>, vector<2x128xf32> -> vector<2x128xf32>
    %89 = arith.addf %51, %88 : vector<2x128xf32>
    %90 = vector.extract_strided_slice %85 {offsets = [2, 0], sizes = [2, 4], strides = [1, 1]} : vector<4x4xf32> to vector<2x4xf32>
    %c0_40 = arith.constant 0 : index
    %c0_41 = arith.constant 0 : index
    %91 = vector.load %arg12[%c0_40, %c0_41] : memref<32x128xf32, #tpu.memory_space<vmem>>, vector<4x128xf32>
    %cst_42 = arith.constant dense<0.000000e+00> : vector<2x128xf32>
    %92 = tpu.matmul %90, %91, %cst_42 {dimension_numbers = #tpu.dot_dimension_numbers<[1], [0], [0], [1], [0, 0, 1, 1], [], []>} : vector<2x4xf32>, vector<4x128xf32>, vector<2x128xf32> -> vector<2x128xf32>
    %93 = arith.addf %89, %92 : vector<2x128xf32>
    %94 = vector.extract_strided_slice %44 {offsets = [4, 0], sizes = [4, 16], strides = [1, 1]} : vector<32x128xf32> to vector<4x16xf32>
    %95 = vector.extract_strided_slice %83 {offsets = [0, 0], sizes = [4, 1], strides = [1, 1]} : vector<4x4xf32> to vector<4x1xf32>
    %96 = vector.broadcast %95 : vector<4x1xf32> to vector<4x16xf32>
    %97 = arith.mulf %96, %45 : vector<4x16xf32>
    %98 = vector.extract_strided_slice %83 {offsets = [0, 1], sizes = [4, 1], strides = [1, 1]} : vector<4x4xf32> to vector<4x1xf32>
    %99 = vector.broadcast %98 : vector<4x1xf32> to vector<4x16xf32>
    %100 = arith.mulf %99, %46 : vector<4x16xf32>
    %101 = arith.addf %97, %100 : vector<4x16xf32>
    %102 = vector.extract_strided_slice %83 {offsets = [0, 2], sizes = [4, 1], strides = [1, 1]} : vector<4x4xf32> to vector<4x1xf32>
    %103 = vector.broadcast %102 : vector<4x1xf32> to vector<4x16xf32>
    %104 = arith.mulf %103, %47 : vector<4x16xf32>
    %105 = arith.addf %101, %104 : vector<4x16xf32>
    %106 = vector.extract_strided_slice %83 {offsets = [0, 3], sizes = [4, 1], strides = [1, 1]} : vector<4x4xf32> to vector<4x1xf32>
    %107 = vector.broadcast %106 : vector<4x1xf32> to vector<4x16xf32>
    %108 = arith.mulf %107, %48 : vector<4x16xf32>
    %109 = arith.addf %105, %108 : vector<4x16xf32>
    %110 = arith.addf %94, %109 : vector<4x16xf32>
    %111 = arith.negf %110 : vector<4x16xf32>
    %112 = math.exp %111 : vector<4x16xf32>
    %cst_43 = arith.constant 1.000000e+00 : f32
    %113 = vector.broadcast %cst_43 : f32 to vector<4x16xf32>
    %114 = arith.addf %113, %112 : vector<4x16xf32>
    %115 = arith.divf %113, %114 : vector<4x16xf32>
    %116 = math.tanh %110 : vector<4x16xf32>
    %117 = vector.extract_strided_slice %115 {offsets = [0, 0], sizes = [4, 4], strides = [1, 1]} : vector<4x16xf32> to vector<4x4xf32>
    %118 = vector.extract_strided_slice %115 {offsets = [0, 4], sizes = [4, 4], strides = [1, 1]} : vector<4x16xf32> to vector<4x4xf32>
    %119 = vector.extract_strided_slice %116 {offsets = [0, 8], sizes = [4, 4], strides = [1, 1]} : vector<4x16xf32> to vector<4x4xf32>
    %120 = vector.extract_strided_slice %115 {offsets = [0, 12], sizes = [4, 4], strides = [1, 1]} : vector<4x16xf32> to vector<4x4xf32>
    %121 = arith.mulf %118, %81 : vector<4x4xf32>
    %122 = arith.mulf %117, %119 : vector<4x4xf32>
    %123 = arith.addf %121, %122 : vector<4x4xf32>
    %124 = math.tanh %123 : vector<4x4xf32>
    %125 = arith.mulf %120, %124 : vector<4x4xf32>
    %cst_44 = arith.constant 0.000000e+00 : f32
    %126 = vector.broadcast %cst_44 : f32 to vector<4x4xf32>
    %127 = arith.maximumf %125, %126 : vector<4x4xf32>
    %128 = vector.extract_strided_slice %127 {offsets = [0, 0], sizes = [2, 4], strides = [1, 1]} : vector<4x4xf32> to vector<2x4xf32>
    %c4_45 = arith.constant 4 : index
    %c0_46 = arith.constant 0 : index
    %129 = vector.load %arg11[%c4_45, %c0_46] : memref<32x128xf32, #tpu.memory_space<vmem>>, vector<4x128xf32>
    %cst_47 = arith.constant dense<0.000000e+00> : vector<2x128xf32>
    %130 = tpu.matmul %128, %129, %cst_47 {dimension_numbers = #tpu.dot_dimension_numbers<[1], [0], [0], [1], [0, 0, 1, 1], [], []>} : vector<2x4xf32>, vector<4x128xf32>, vector<2x128xf32> -> vector<2x128xf32>
    %131 = arith.addf %93, %130 : vector<2x128xf32>
    %132 = vector.extract_strided_slice %127 {offsets = [2, 0], sizes = [2, 4], strides = [1, 1]} : vector<4x4xf32> to vector<2x4xf32>
    %c4_48 = arith.constant 4 : index
    %c0_49 = arith.constant 0 : index
    %133 = vector.load %arg12[%c4_48, %c0_49] : memref<32x128xf32, #tpu.memory_space<vmem>>, vector<4x128xf32>
    %cst_50 = arith.constant dense<0.000000e+00> : vector<2x128xf32>
    %134 = tpu.matmul %132, %133, %cst_50 {dimension_numbers = #tpu.dot_dimension_numbers<[1], [0], [0], [1], [0, 0, 1, 1], [], []>} : vector<2x4xf32>, vector<4x128xf32>, vector<2x128xf32> -> vector<2x128xf32>
    %135 = arith.addf %131, %134 : vector<2x128xf32>
    %136 = vector.extract_strided_slice %44 {offsets = [8, 0], sizes = [4, 16], strides = [1, 1]} : vector<32x128xf32> to vector<4x16xf32>
    %137 = vector.extract_strided_slice %125 {offsets = [0, 0], sizes = [4, 1], strides = [1, 1]} : vector<4x4xf32> to vector<4x1xf32>
    %138 = vector.broadcast %137 : vector<4x1xf32> to vector<4x16xf32>
    %139 = arith.mulf %138, %45 : vector<4x16xf32>
    %140 = vector.extract_strided_slice %125 {offsets = [0, 1], sizes = [4, 1], strides = [1, 1]} : vector<4x4xf32> to vector<4x1xf32>
    %141 = vector.broadcast %140 : vector<4x1xf32> to vector<4x16xf32>
    %142 = arith.mulf %141, %46 : vector<4x16xf32>
    %143 = arith.addf %139, %142 : vector<4x16xf32>
    %144 = vector.extract_strided_slice %125 {offsets = [0, 2], sizes = [4, 1], strides = [1, 1]} : vector<4x4xf32> to vector<4x1xf32>
    %145 = vector.broadcast %144 : vector<4x1xf32> to vector<4x16xf32>
    %146 = arith.mulf %145, %47 : vector<4x16xf32>
    %147 = arith.addf %143, %146 : vector<4x16xf32>
    %148 = vector.extract_strided_slice %125 {offsets = [0, 3], sizes = [4, 1], strides = [1, 1]} : vector<4x4xf32> to vector<4x1xf32>
    %149 = vector.broadcast %148 : vector<4x1xf32> to vector<4x16xf32>
    %150 = arith.mulf %149, %48 : vector<4x16xf32>
    %151 = arith.addf %147, %150 : vector<4x16xf32>
    %152 = arith.addf %136, %151 : vector<4x16xf32>
    %153 = arith.negf %152 : vector<4x16xf32>
    %154 = math.exp %153 : vector<4x16xf32>
    %cst_51 = arith.constant 1.000000e+00 : f32
    %155 = vector.broadcast %cst_51 : f32 to vector<4x16xf32>
    %156 = arith.addf %155, %154 : vector<4x16xf32>
    %157 = arith.divf %155, %156 : vector<4x16xf32>
    %158 = math.tanh %152 : vector<4x16xf32>
    %159 = vector.extract_strided_slice %157 {offsets = [0, 0], sizes = [4, 4], strides = [1, 1]} : vector<4x16xf32> to vector<4x4xf32>
    %160 = vector.extract_strided_slice %157 {offsets = [0, 4], sizes = [4, 4], strides = [1, 1]} : vector<4x16xf32> to vector<4x4xf32>
    %161 = vector.extract_strided_slice %158 {offsets = [0, 8], sizes = [4, 4], strides = [1, 1]} : vector<4x16xf32> to vector<4x4xf32>
    %162 = vector.extract_strided_slice %157 {offsets = [0, 12], sizes = [4, 4], strides = [1, 1]} : vector<4x16xf32> to vector<4x4xf32>
    %163 = arith.mulf %160, %123 : vector<4x4xf32>
    %164 = arith.mulf %159, %161 : vector<4x4xf32>
    %165 = arith.addf %163, %164 : vector<4x4xf32>
    %166 = math.tanh %165 : vector<4x4xf32>
    %167 = arith.mulf %162, %166 : vector<4x4xf32>
    %cst_52 = arith.constant 0.000000e+00 : f32
    %168 = vector.broadcast %cst_52 : f32 to vector<4x4xf32>
    %169 = arith.maximumf %167, %168 : vector<4x4xf32>
    %170 = vector.extract_strided_slice %169 {offsets = [0, 0], sizes = [2, 4], strides = [1, 1]} : vector<4x4xf32> to vector<2x4xf32>
    %c8_53 = arith.constant 8 : index
    %c0_54 = arith.constant 0 : index
    %171 = vector.load %arg11[%c8_53, %c0_54] : memref<32x128xf32, #tpu.memory_space<vmem>>, vector<4x128xf32>
    %cst_55 = arith.constant dense<0.000000e+00> : vector<2x128xf32>
    %172 = tpu.matmul %170, %171, %cst_55 {dimension_numbers = #tpu.dot_dimension_numbers<[1], [0], [0], [1], [0, 0, 1, 1], [], []>} : vector<2x4xf32>, vector<4x128xf32>, vector<2x128xf32> -> vector<2x128xf32>
    %173 = arith.addf %135, %172 : vector<2x128xf32>
    %174 = vector.extract_strided_slice %169 {offsets = [2, 0], sizes = [2, 4], strides = [1, 1]} : vector<4x4xf32> to vector<2x4xf32>
    %c8_56 = arith.constant 8 : index
    %c0_57 = arith.constant 0 : index
    %175 = vector.load %arg12[%c8_56, %c0_57] : memref<32x128xf32, #tpu.memory_space<vmem>>, vector<4x128xf32>
    %cst_58 = arith.constant dense<0.000000e+00> : vector<2x128xf32>
    %176 = tpu.matmul %174, %175, %cst_58 {dimension_numbers = #tpu.dot_dimension_numbers<[1], [0], [0], [1], [0, 0, 1, 1], [], []>} : vector<2x4xf32>, vector<4x128xf32>, vector<2x128xf32> -> vector<2x128xf32>
    %177 = arith.addf %173, %176 : vector<2x128xf32>
    %178 = vector.extract_strided_slice %44 {offsets = [12, 0], sizes = [4, 16], strides = [1, 1]} : vector<32x128xf32> to vector<4x16xf32>
    %179 = vector.extract_strided_slice %167 {offsets = [0, 0], sizes = [4, 1], strides = [1, 1]} : vector<4x4xf32> to vector<4x1xf32>
    %180 = vector.broadcast %179 : vector<4x1xf32> to vector<4x16xf32>
    %181 = arith.mulf %180, %45 : vector<4x16xf32>
    %182 = vector.extract_strided_slice %167 {offsets = [0, 1], sizes = [4, 1], strides = [1, 1]} : vector<4x4xf32> to vector<4x1xf32>
    %183 = vector.broadcast %182 : vector<4x1xf32> to vector<4x16xf32>
    %184 = arith.mulf %183, %46 : vector<4x16xf32>
    %185 = arith.addf %181, %184 : vector<4x16xf32>
    %186 = vector.extract_strided_slice %167 {offsets = [0, 2], sizes = [4, 1], strides = [1, 1]} : vector<4x4xf32> to vector<4x1xf32>
    %187 = vector.broadcast %186 : vector<4x1xf32> to vector<4x16xf32>
    %188 = arith.mulf %187, %47 : vector<4x16xf32>
    %189 = arith.addf %185, %188 : vector<4x16xf32>
    %190 = vector.extract_strided_slice %167 {offsets = [0, 3], sizes = [4, 1], strides = [1, 1]} : vector<4x4xf32> to vector<4x1xf32>
    %191 = vector.broadcast %190 : vector<4x1xf32> to vector<4x16xf32>
    %192 = arith.mulf %191, %48 : vector<4x16xf32>
    %193 = arith.addf %189, %192 : vector<4x16xf32>
    %194 = arith.addf %178, %193 : vector<4x16xf32>
    %195 = arith.negf %194 : vector<4x16xf32>
    %196 = math.exp %195 : vector<4x16xf32>
    %cst_59 = arith.constant 1.000000e+00 : f32
    %197 = vector.broadcast %cst_59 : f32 to vector<4x16xf32>
    %198 = arith.addf %197, %196 : vector<4x16xf32>
    %199 = arith.divf %197, %198 : vector<4x16xf32>
    %200 = math.tanh %194 : vector<4x16xf32>
    %201 = vector.extract_strided_slice %199 {offsets = [0, 0], sizes = [4, 4], strides = [1, 1]} : vector<4x16xf32> to vector<4x4xf32>
    %202 = vector.extract_strided_slice %199 {offsets = [0, 4], sizes = [4, 4], strides = [1, 1]} : vector<4x16xf32> to vector<4x4xf32>
    %203 = vector.extract_strided_slice %200 {offsets = [0, 8], sizes = [4, 4], strides = [1, 1]} : vector<4x16xf32> to vector<4x4xf32>
    %204 = vector.extract_strided_slice %199 {offsets = [0, 12], sizes = [4, 4], strides = [1, 1]} : vector<4x16xf32> to vector<4x4xf32>
    %205 = arith.mulf %202, %165 : vector<4x4xf32>
    %206 = arith.mulf %201, %203 : vector<4x4xf32>
    %207 = arith.addf %205, %206 : vector<4x4xf32>
    %208 = math.tanh %207 : vector<4x4xf32>
    %209 = arith.mulf %204, %208 : vector<4x4xf32>
    %cst_60 = arith.constant 0.000000e+00 : f32
    %210 = vector.broadcast %cst_60 : f32 to vector<4x4xf32>
    %211 = arith.maximumf %209, %210 : vector<4x4xf32>
    %212 = vector.extract_strided_slice %211 {offsets = [0, 0], sizes = [2, 4], strides = [1, 1]} : vector<4x4xf32> to vector<2x4xf32>
    %c12_61 = arith.constant 12 : index
    %c0_62 = arith.constant 0 : index
    %213 = vector.load %arg11[%c12_61, %c0_62] : memref<32x128xf32, #tpu.memory_space<vmem>>, vector<4x128xf32>
    %cst_63 = arith.constant dense<0.000000e+00> : vector<2x128xf32>
    %214 = tpu.matmul %212, %213, %cst_63 {dimension_numbers = #tpu.dot_dimension_numbers<[1], [0], [0], [1], [0, 0, 1, 1], [], []>} : vector<2x4xf32>, vector<4x128xf32>, vector<2x128xf32> -> vector<2x128xf32>
    %215 = arith.addf %177, %214 : vector<2x128xf32>
    %216 = vector.extract_strided_slice %211 {offsets = [2, 0], sizes = [2, 4], strides = [1, 1]} : vector<4x4xf32> to vector<2x4xf32>
    %c12_64 = arith.constant 12 : index
    %c0_65 = arith.constant 0 : index
    %217 = vector.load %arg12[%c12_64, %c0_65] : memref<32x128xf32, #tpu.memory_space<vmem>>, vector<4x128xf32>
    %cst_66 = arith.constant dense<0.000000e+00> : vector<2x128xf32>
    %218 = tpu.matmul %216, %217, %cst_66 {dimension_numbers = #tpu.dot_dimension_numbers<[1], [0], [0], [1], [0, 0, 1, 1], [], []>} : vector<2x4xf32>, vector<4x128xf32>, vector<2x128xf32> -> vector<2x128xf32>
    %219 = arith.addf %215, %218 : vector<2x128xf32>
    %220 = vector.extract_strided_slice %44 {offsets = [16, 0], sizes = [4, 16], strides = [1, 1]} : vector<32x128xf32> to vector<4x16xf32>
    %221 = vector.extract_strided_slice %209 {offsets = [0, 0], sizes = [4, 1], strides = [1, 1]} : vector<4x4xf32> to vector<4x1xf32>
    %222 = vector.broadcast %221 : vector<4x1xf32> to vector<4x16xf32>
    %223 = arith.mulf %222, %45 : vector<4x16xf32>
    %224 = vector.extract_strided_slice %209 {offsets = [0, 1], sizes = [4, 1], strides = [1, 1]} : vector<4x4xf32> to vector<4x1xf32>
    %225 = vector.broadcast %224 : vector<4x1xf32> to vector<4x16xf32>
    %226 = arith.mulf %225, %46 : vector<4x16xf32>
    %227 = arith.addf %223, %226 : vector<4x16xf32>
    %228 = vector.extract_strided_slice %209 {offsets = [0, 2], sizes = [4, 1], strides = [1, 1]} : vector<4x4xf32> to vector<4x1xf32>
    %229 = vector.broadcast %228 : vector<4x1xf32> to vector<4x16xf32>
    %230 = arith.mulf %229, %47 : vector<4x16xf32>
    %231 = arith.addf %227, %230 : vector<4x16xf32>
    %232 = vector.extract_strided_slice %209 {offsets = [0, 3], sizes = [4, 1], strides = [1, 1]} : vector<4x4xf32> to vector<4x1xf32>
    %233 = vector.broadcast %232 : vector<4x1xf32> to vector<4x16xf32>
    %234 = arith.mulf %233, %48 : vector<4x16xf32>
    %235 = arith.addf %231, %234 : vector<4x16xf32>
    %236 = arith.addf %220, %235 : vector<4x16xf32>
    %237 = arith.negf %236 : vector<4x16xf32>
    %238 = math.exp %237 : vector<4x16xf32>
    %cst_67 = arith.constant 1.000000e+00 : f32
    %239 = vector.broadcast %cst_67 : f32 to vector<4x16xf32>
    %240 = arith.addf %239, %238 : vector<4x16xf32>
    %241 = arith.divf %239, %240 : vector<4x16xf32>
    %242 = math.tanh %236 : vector<4x16xf32>
    %243 = vector.extract_strided_slice %241 {offsets = [0, 0], sizes = [4, 4], strides = [1, 1]} : vector<4x16xf32> to vector<4x4xf32>
    %244 = vector.extract_strided_slice %241 {offsets = [0, 4], sizes = [4, 4], strides = [1, 1]} : vector<4x16xf32> to vector<4x4xf32>
    %245 = vector.extract_strided_slice %242 {offsets = [0, 8], sizes = [4, 4], strides = [1, 1]} : vector<4x16xf32> to vector<4x4xf32>
    %246 = vector.extract_strided_slice %241 {offsets = [0, 12], sizes = [4, 4], strides = [1, 1]} : vector<4x16xf32> to vector<4x4xf32>
    %247 = arith.mulf %244, %207 : vector<4x4xf32>
    %248 = arith.mulf %243, %245 : vector<4x4xf32>
    %249 = arith.addf %247, %248 : vector<4x4xf32>
    %250 = math.tanh %249 : vector<4x4xf32>
    %251 = arith.mulf %246, %250 : vector<4x4xf32>
    %cst_68 = arith.constant 0.000000e+00 : f32
    %252 = vector.broadcast %cst_68 : f32 to vector<4x4xf32>
    %253 = arith.maximumf %251, %252 : vector<4x4xf32>
    %254 = vector.extract_strided_slice %253 {offsets = [0, 0], sizes = [2, 4], strides = [1, 1]} : vector<4x4xf32> to vector<2x4xf32>
    %c16 = arith.constant 16 : index
    %c0_69 = arith.constant 0 : index
    %255 = vector.load %arg11[%c16, %c0_69] : memref<32x128xf32, #tpu.memory_space<vmem>>, vector<4x128xf32>
    %cst_70 = arith.constant dense<0.000000e+00> : vector<2x128xf32>
    %256 = tpu.matmul %254, %255, %cst_70 {dimension_numbers = #tpu.dot_dimension_numbers<[1], [0], [0], [1], [0, 0, 1, 1], [], []>} : vector<2x4xf32>, vector<4x128xf32>, vector<2x128xf32> -> vector<2x128xf32>
    %257 = arith.addf %219, %256 : vector<2x128xf32>
    %258 = vector.extract_strided_slice %253 {offsets = [2, 0], sizes = [2, 4], strides = [1, 1]} : vector<4x4xf32> to vector<2x4xf32>
    %c16_71 = arith.constant 16 : index
    %c0_72 = arith.constant 0 : index
    %259 = vector.load %arg12[%c16_71, %c0_72] : memref<32x128xf32, #tpu.memory_space<vmem>>, vector<4x128xf32>
    %cst_73 = arith.constant dense<0.000000e+00> : vector<2x128xf32>
    %260 = tpu.matmul %258, %259, %cst_73 {dimension_numbers = #tpu.dot_dimension_numbers<[1], [0], [0], [1], [0, 0, 1, 1], [], []>} : vector<2x4xf32>, vector<4x128xf32>, vector<2x128xf32> -> vector<2x128xf32>
    %261 = arith.addf %257, %260 : vector<2x128xf32>
    %262 = vector.extract_strided_slice %44 {offsets = [20, 0], sizes = [4, 16], strides = [1, 1]} : vector<32x128xf32> to vector<4x16xf32>
    %263 = vector.extract_strided_slice %251 {offsets = [0, 0], sizes = [4, 1], strides = [1, 1]} : vector<4x4xf32> to vector<4x1xf32>
    %264 = vector.broadcast %263 : vector<4x1xf32> to vector<4x16xf32>
    %265 = arith.mulf %264, %45 : vector<4x16xf32>
    %266 = vector.extract_strided_slice %251 {offsets = [0, 1], sizes = [4, 1], strides = [1, 1]} : vector<4x4xf32> to vector<4x1xf32>
    %267 = vector.broadcast %266 : vector<4x1xf32> to vector<4x16xf32>
    %268 = arith.mulf %267, %46 : vector<4x16xf32>
    %269 = arith.addf %265, %268 : vector<4x16xf32>
    %270 = vector.extract_strided_slice %251 {offsets = [0, 2], sizes = [4, 1], strides = [1, 1]} : vector<4x4xf32> to vector<4x1xf32>
    %271 = vector.broadcast %270 : vector<4x1xf32> to vector<4x16xf32>
    %272 = arith.mulf %271, %47 : vector<4x16xf32>
    %273 = arith.addf %269, %272 : vector<4x16xf32>
    %274 = vector.extract_strided_slice %251 {offsets = [0, 3], sizes = [4, 1], strides = [1, 1]} : vector<4x4xf32> to vector<4x1xf32>
    %275 = vector.broadcast %274 : vector<4x1xf32> to vector<4x16xf32>
    %276 = arith.mulf %275, %48 : vector<4x16xf32>
    %277 = arith.addf %273, %276 : vector<4x16xf32>
    %278 = arith.addf %262, %277 : vector<4x16xf32>
    %279 = arith.negf %278 : vector<4x16xf32>
    %280 = math.exp %279 : vector<4x16xf32>
    %cst_74 = arith.constant 1.000000e+00 : f32
    %281 = vector.broadcast %cst_74 : f32 to vector<4x16xf32>
    %282 = arith.addf %281, %280 : vector<4x16xf32>
    %283 = arith.divf %281, %282 : vector<4x16xf32>
    %284 = math.tanh %278 : vector<4x16xf32>
    %285 = vector.extract_strided_slice %283 {offsets = [0, 0], sizes = [4, 4], strides = [1, 1]} : vector<4x16xf32> to vector<4x4xf32>
    %286 = vector.extract_strided_slice %283 {offsets = [0, 4], sizes = [4, 4], strides = [1, 1]} : vector<4x16xf32> to vector<4x4xf32>
    %287 = vector.extract_strided_slice %284 {offsets = [0, 8], sizes = [4, 4], strides = [1, 1]} : vector<4x16xf32> to vector<4x4xf32>
    %288 = vector.extract_strided_slice %283 {offsets = [0, 12], sizes = [4, 4], strides = [1, 1]} : vector<4x16xf32> to vector<4x4xf32>
    %289 = arith.mulf %286, %249 : vector<4x4xf32>
    %290 = arith.mulf %285, %287 : vector<4x4xf32>
    %291 = arith.addf %289, %290 : vector<4x4xf32>
    %292 = math.tanh %291 : vector<4x4xf32>
    %293 = arith.mulf %288, %292 : vector<4x4xf32>
    %cst_75 = arith.constant 0.000000e+00 : f32
    %294 = vector.broadcast %cst_75 : f32 to vector<4x4xf32>
    %295 = arith.maximumf %293, %294 : vector<4x4xf32>
    %296 = vector.extract_strided_slice %295 {offsets = [0, 0], sizes = [2, 4], strides = [1, 1]} : vector<4x4xf32> to vector<2x4xf32>
    %c20 = arith.constant 20 : index
    %c0_76 = arith.constant 0 : index
    %297 = vector.load %arg11[%c20, %c0_76] : memref<32x128xf32, #tpu.memory_space<vmem>>, vector<4x128xf32>
    %cst_77 = arith.constant dense<0.000000e+00> : vector<2x128xf32>
    %298 = tpu.matmul %296, %297, %cst_77 {dimension_numbers = #tpu.dot_dimension_numbers<[1], [0], [0], [1], [0, 0, 1, 1], [], []>} : vector<2x4xf32>, vector<4x128xf32>, vector<2x128xf32> -> vector<2x128xf32>
    %299 = arith.addf %261, %298 : vector<2x128xf32>
    %300 = vector.extract_strided_slice %295 {offsets = [2, 0], sizes = [2, 4], strides = [1, 1]} : vector<4x4xf32> to vector<2x4xf32>
    %c20_78 = arith.constant 20 : index
    %c0_79 = arith.constant 0 : index
    %301 = vector.load %arg12[%c20_78, %c0_79] : memref<32x128xf32, #tpu.memory_space<vmem>>, vector<4x128xf32>
    %cst_80 = arith.constant dense<0.000000e+00> : vector<2x128xf32>
    %302 = tpu.matmul %300, %301, %cst_80 {dimension_numbers = #tpu.dot_dimension_numbers<[1], [0], [0], [1], [0, 0, 1, 1], [], []>} : vector<2x4xf32>, vector<4x128xf32>, vector<2x128xf32> -> vector<2x128xf32>
    %303 = arith.addf %299, %302 : vector<2x128xf32>
    %304 = vector.extract_strided_slice %44 {offsets = [24, 0], sizes = [4, 16], strides = [1, 1]} : vector<32x128xf32> to vector<4x16xf32>
    %305 = vector.extract_strided_slice %293 {offsets = [0, 0], sizes = [4, 1], strides = [1, 1]} : vector<4x4xf32> to vector<4x1xf32>
    %306 = vector.broadcast %305 : vector<4x1xf32> to vector<4x16xf32>
    %307 = arith.mulf %306, %45 : vector<4x16xf32>
    %308 = vector.extract_strided_slice %293 {offsets = [0, 1], sizes = [4, 1], strides = [1, 1]} : vector<4x4xf32> to vector<4x1xf32>
    %309 = vector.broadcast %308 : vector<4x1xf32> to vector<4x16xf32>
    %310 = arith.mulf %309, %46 : vector<4x16xf32>
    %311 = arith.addf %307, %310 : vector<4x16xf32>
    %312 = vector.extract_strided_slice %293 {offsets = [0, 2], sizes = [4, 1], strides = [1, 1]} : vector<4x4xf32> to vector<4x1xf32>
    %313 = vector.broadcast %312 : vector<4x1xf32> to vector<4x16xf32>
    %314 = arith.mulf %313, %47 : vector<4x16xf32>
    %315 = arith.addf %311, %314 : vector<4x16xf32>
    %316 = vector.extract_strided_slice %293 {offsets = [0, 3], sizes = [4, 1], strides = [1, 1]} : vector<4x4xf32> to vector<4x1xf32>
    %317 = vector.broadcast %316 : vector<4x1xf32> to vector<4x16xf32>
    %318 = arith.mulf %317, %48 : vector<4x16xf32>
    %319 = arith.addf %315, %318 : vector<4x16xf32>
    %320 = arith.addf %304, %319 : vector<4x16xf32>
    %321 = arith.negf %320 : vector<4x16xf32>
    %322 = math.exp %321 : vector<4x16xf32>
    %cst_81 = arith.constant 1.000000e+00 : f32
    %323 = vector.broadcast %cst_81 : f32 to vector<4x16xf32>
    %324 = arith.addf %323, %322 : vector<4x16xf32>
    %325 = arith.divf %323, %324 : vector<4x16xf32>
    %326 = math.tanh %320 : vector<4x16xf32>
    %327 = vector.extract_strided_slice %325 {offsets = [0, 0], sizes = [4, 4], strides = [1, 1]} : vector<4x16xf32> to vector<4x4xf32>
    %328 = vector.extract_strided_slice %325 {offsets = [0, 4], sizes = [4, 4], strides = [1, 1]} : vector<4x16xf32> to vector<4x4xf32>
    %329 = vector.extract_strided_slice %326 {offsets = [0, 8], sizes = [4, 4], strides = [1, 1]} : vector<4x16xf32> to vector<4x4xf32>
    %330 = vector.extract_strided_slice %325 {offsets = [0, 12], sizes = [4, 4], strides = [1, 1]} : vector<4x16xf32> to vector<4x4xf32>
    %331 = arith.mulf %328, %291 : vector<4x4xf32>
    %332 = arith.mulf %327, %329 : vector<4x4xf32>
    %333 = arith.addf %331, %332 : vector<4x4xf32>
    %334 = math.tanh %333 : vector<4x4xf32>
    %335 = arith.mulf %330, %334 : vector<4x4xf32>
    %cst_82 = arith.constant 0.000000e+00 : f32
    %336 = vector.broadcast %cst_82 : f32 to vector<4x4xf32>
    %337 = arith.maximumf %335, %336 : vector<4x4xf32>
    %338 = vector.extract_strided_slice %337 {offsets = [0, 0], sizes = [2, 4], strides = [1, 1]} : vector<4x4xf32> to vector<2x4xf32>
    %c24 = arith.constant 24 : index
    %c0_83 = arith.constant 0 : index
    %339 = vector.load %arg11[%c24, %c0_83] : memref<32x128xf32, #tpu.memory_space<vmem>>, vector<4x128xf32>
    %cst_84 = arith.constant dense<0.000000e+00> : vector<2x128xf32>
    %340 = tpu.matmul %338, %339, %cst_84 {dimension_numbers = #tpu.dot_dimension_numbers<[1], [0], [0], [1], [0, 0, 1, 1], [], []>} : vector<2x4xf32>, vector<4x128xf32>, vector<2x128xf32> -> vector<2x128xf32>
    %341 = arith.addf %303, %340 : vector<2x128xf32>
    %342 = vector.extract_strided_slice %337 {offsets = [2, 0], sizes = [2, 4], strides = [1, 1]} : vector<4x4xf32> to vector<2x4xf32>
    %c24_85 = arith.constant 24 : index
    %c0_86 = arith.constant 0 : index
    %343 = vector.load %arg12[%c24_85, %c0_86] : memref<32x128xf32, #tpu.memory_space<vmem>>, vector<4x128xf32>
    %cst_87 = arith.constant dense<0.000000e+00> : vector<2x128xf32>
    %344 = tpu.matmul %342, %343, %cst_87 {dimension_numbers = #tpu.dot_dimension_numbers<[1], [0], [0], [1], [0, 0, 1, 1], [], []>} : vector<2x4xf32>, vector<4x128xf32>, vector<2x128xf32> -> vector<2x128xf32>
    %345 = arith.addf %341, %344 : vector<2x128xf32>
    %346 = vector.extract_strided_slice %44 {offsets = [28, 0], sizes = [4, 16], strides = [1, 1]} : vector<32x128xf32> to vector<4x16xf32>
    %347 = vector.extract_strided_slice %335 {offsets = [0, 0], sizes = [4, 1], strides = [1, 1]} : vector<4x4xf32> to vector<4x1xf32>
    %348 = vector.broadcast %347 : vector<4x1xf32> to vector<4x16xf32>
    %349 = arith.mulf %348, %45 : vector<4x16xf32>
    %350 = vector.extract_strided_slice %335 {offsets = [0, 1], sizes = [4, 1], strides = [1, 1]} : vector<4x4xf32> to vector<4x1xf32>
    %351 = vector.broadcast %350 : vector<4x1xf32> to vector<4x16xf32>
    %352 = arith.mulf %351, %46 : vector<4x16xf32>
    %353 = arith.addf %349, %352 : vector<4x16xf32>
    %354 = vector.extract_strided_slice %335 {offsets = [0, 2], sizes = [4, 1], strides = [1, 1]} : vector<4x4xf32> to vector<4x1xf32>
    %355 = vector.broadcast %354 : vector<4x1xf32> to vector<4x16xf32>
    %356 = arith.mulf %355, %47 : vector<4x16xf32>
    %357 = arith.addf %353, %356 : vector<4x16xf32>
    %358 = vector.extract_strided_slice %335 {offsets = [0, 3], sizes = [4, 1], strides = [1, 1]} : vector<4x4xf32> to vector<4x1xf32>
    %359 = vector.broadcast %358 : vector<4x1xf32> to vector<4x16xf32>
    %360 = arith.mulf %359, %48 : vector<4x16xf32>
    %361 = arith.addf %357, %360 : vector<4x16xf32>
    %362 = arith.addf %346, %361 : vector<4x16xf32>
    %363 = arith.negf %362 : vector<4x16xf32>
    %364 = math.exp %363 : vector<4x16xf32>
    %cst_88 = arith.constant 1.000000e+00 : f32
    %365 = vector.broadcast %cst_88 : f32 to vector<4x16xf32>
    %366 = arith.addf %365, %364 : vector<4x16xf32>
    %367 = arith.divf %365, %366 : vector<4x16xf32>
    %368 = math.tanh %362 : vector<4x16xf32>
    %369 = vector.extract_strided_slice %367 {offsets = [0, 0], sizes = [4, 4], strides = [1, 1]} : vector<4x16xf32> to vector<4x4xf32>
    %370 = vector.extract_strided_slice %367 {offsets = [0, 4], sizes = [4, 4], strides = [1, 1]} : vector<4x16xf32> to vector<4x4xf32>
    %371 = vector.extract_strided_slice %368 {offsets = [0, 8], sizes = [4, 4], strides = [1, 1]} : vector<4x16xf32> to vector<4x4xf32>
    %372 = vector.extract_strided_slice %367 {offsets = [0, 12], sizes = [4, 4], strides = [1, 1]} : vector<4x16xf32> to vector<4x4xf32>
    %373 = arith.mulf %370, %333 : vector<4x4xf32>
    %374 = arith.mulf %369, %371 : vector<4x4xf32>
    %375 = arith.addf %373, %374 : vector<4x4xf32>
    %376 = math.tanh %375 : vector<4x4xf32>
    %377 = arith.mulf %372, %376 : vector<4x4xf32>
    %cst_89 = arith.constant 0.000000e+00 : f32
    %378 = vector.broadcast %cst_89 : f32 to vector<4x4xf32>
    %379 = arith.maximumf %377, %378 : vector<4x4xf32>
    %380 = vector.extract_strided_slice %379 {offsets = [0, 0], sizes = [2, 4], strides = [1, 1]} : vector<4x4xf32> to vector<2x4xf32>
    %c28 = arith.constant 28 : index
    %c0_90 = arith.constant 0 : index
    %381 = vector.load %arg11[%c28, %c0_90] : memref<32x128xf32, #tpu.memory_space<vmem>>, vector<4x128xf32>
    %cst_91 = arith.constant dense<0.000000e+00> : vector<2x128xf32>
    %382 = tpu.matmul %380, %381, %cst_91 {dimension_numbers = #tpu.dot_dimension_numbers<[1], [0], [0], [1], [0, 0, 1, 1], [], []>} : vector<2x4xf32>, vector<4x128xf32>, vector<2x128xf32> -> vector<2x128xf32>
    %383 = arith.addf %345, %382 : vector<2x128xf32>
    %384 = vector.extract_strided_slice %379 {offsets = [2, 0], sizes = [2, 4], strides = [1, 1]} : vector<4x4xf32> to vector<2x4xf32>
    %c28_92 = arith.constant 28 : index
    %c0_93 = arith.constant 0 : index
    %385 = vector.load %arg12[%c28_92, %c0_93] : memref<32x128xf32, #tpu.memory_space<vmem>>, vector<4x128xf32>
    %cst_94 = arith.constant dense<0.000000e+00> : vector<2x128xf32>
    %386 = tpu.matmul %384, %385, %cst_94 {dimension_numbers = #tpu.dot_dimension_numbers<[1], [0], [0], [1], [0, 0, 1, 1], [], []>} : vector<2x4xf32>, vector<4x128xf32>, vector<2x128xf32> -> vector<2x128xf32>
    %387 = arith.addf %383, %386 : vector<2x128xf32>
    %c0_95 = arith.constant 0 : index
    %c0_96 = arith.constant 0 : index
    %388 = vector.load %arg13[%c0_95, %c0_96] : memref<1x128xf32, #tpu.memory_space<vmem>>, vector<1x128xf32>
    %389 = vector.broadcast %388 : vector<1x128xf32> to vector<2x128xf32>
    %390 = arith.addf %387, %389 : vector<2x128xf32>
    %c0_97 = arith.constant 0 : index
    %c0_98 = arith.constant 0 : index
    %391 = vector.load %arg14[%c0_97, %c0_98] : memref<2x128xf32, #tpu.memory_space<vmem>>, vector<2x128xf32>
    tpu.vector_store %arg14[%c0_97, %c0_98], %390 {strides = array<i32>} : memref<2x128xf32, #tpu.memory_space<vmem>>, vector<2x128xf32>,
    return
  }
  func.func @transform_0(%arg0: i32) -> (i32, i32) {
    %c0_i32 = arith.constant 0 : i32
    %c0_i32_0 = arith.constant 0 : i32
    %c0_i32_1 = arith.constant 0 : i32
    return %c0_i32, %c0_i32_0 : i32, i32
  }
  func.func @transform_1(%arg0: i32) -> (i32, i32) {
    %c0_i32 = arith.constant 0 : i32
    %c0_i32_0 = arith.constant 0 : i32
    %c0_i32_1 = arith.constant 0 : i32
    return %c0_i32, %c0_i32_0 : i32, i32
  }
  func.func @transform_2(%arg0: i32) -> (i32, i32) {
    %c0_i32 = arith.constant 0 : i32
    %c0_i32_0 = arith.constant 0 : i32
    %c0_i32_1 = arith.constant 0 : i32
    return %c0_i32, %c0_i32_0 : i32, i32
  }
  func.func @transform_3(%arg0: i32) -> (i32, i32) {
    %c0_i32 = arith.constant 0 : i32
    %c0_i32_0 = arith.constant 0 : i32
    %c0_i32_1 = arith.constant 0 : i32
    return %c0_i32, %c0_i32_0 : i32, i32
  }
  func.func @transform_4(%arg0: i32) -> (i32, i32) {
    %c0_i32 = arith.constant 0 : i32
    %c0_i32_0 = arith.constant 0 : i32
    %c0_i32_1 = arith.constant 0 : i32
    return %c0_i32, %c0_i32_0 : i32, i32
  }
  func.func @transform_5(%arg0: i32) -> (i32, i32) {
    %c0_i32 = arith.constant 0 : i32
    %c0_i32_0 = arith.constant 0 : i32
    %c0_i32_1 = arith.constant 0 : i32
    return %c0_i32, %c0_i32_0 : i32, i32
  }
  func.func @transform_6(%arg0: i32) -> (i32, i32) {
    %c0_i32 = arith.constant 0 : i32
    %c0_i32_0 = arith.constant 0 : i32
    %c0_i32_1 = arith.constant 0 : i32
    return %c0_i32, %c0_i32_0 : i32, i32
  }
  func.func @transform_7(%arg0: i32) -> (i32, i32) {
    %c0_i32 = arith.constant 0 : i32
    %c0_i32_0 = arith.constant 0 : i32
    %c0_i32_1 = arith.constant 0 : i32
    return %c0_i32, %c0_i32_0 : i32, i32
  }
  func.func @transform_8(%arg0: i32) -> (i32, i32) {
    %c0_i32 = arith.constant 0 : i32
    %c0_i32_0 = arith.constant 0 : i32
    %c0_i32_1 = arith.constant 0 : i32
    return %c0_i32, %c0_i32_0 : i32, i32
  }
  func.func @transform_9(%arg0: i32) -> (i32, i32) {
    %c0_i32 = arith.constant 0 : i32
    %c0_i32_0 = arith.constant 0 : i32
    %c0_i32_1 = arith.constant 0 : i32
    return %c0_i32, %c0_i32_0 : i32, i32
  }
  func.func @transform_10(%arg0: i32) -> (i32, i32) {
    %c0_i32 = arith.constant 0 : i32
    %c0_i32_0 = arith.constant 0 : i32
    %c0_i32_1 = arith.constant 0 : i32
    return %c0_i32, %c0_i32_0 : i32, i32
  }
  func.func @transform_11(%arg0: i32) -> (i32, i32) {
    %c0_i32 = arith.constant 0 : i32
    %c0_i32_0 = arith.constant 0 : i32
    %c0_i32_1 = arith.constant 0 : i32
    return %c0_i32, %c0_i32_0 : i32, i32
  }
  func.func @transform_12(%arg0: i32) -> (i32, i32) {
    %c0_i32 = arith.constant 0 : i32
    %c0_i32_0 = arith.constant 0 : i32
    %c0_i32_1 = arith.constant 0 : i32
    return %c0_i32, %c0_i32_0 : i32, i32
  }
  func.func @transform_13(%arg0: i32) -> (i32, i32) {
    %c0_i32 = arith.constant 0 : i32
    %c0_i32_0 = arith.constant 0 : i32
    %c0_i32_1 = arith.constant 0 : i32
    return %c0_i32, %c0_i32_0 : i32, i32
  }
}

</mosaic_0001>

<bundles_post_ra>
// kernel: attention_forward.1
= control target key start
LH: loop header
LB: loop body
LE: loop exit
PB: predicated region body
PF: predicated region fallthrough
CT: control target
= control target key end

     0   :  { %18 = vsyncpa [#allocation3], 0  ;;  %s3681_s0 = inlined_call_operand.vmem [shape: s32[16,1], index: 0, kind: input, shape index: {}]   ;;  %s3682_s1 = inlined_call_operand.vmem [shape: f32[50,40], index: 1, kind: input, shape index: {}]   ;;  %s3683_s2 = inlined_call_operand.vmem [shape: f32[40,384], index: 2, kind: input, shape index: {}]   ;;  %s3684_s3 = inlined_call_operand.hbm [shape: f32[1,384], index: 3, kind: input, shape index: {}]   ;;  %s3685_s4 = inlined_call_operand.vmem [shape: f32[16,16], index: 4, kind: input, shape index: {}]   ;;  %s3686_s5 = inlined_call_operand.hbm [shape: f32[128,256], index: 5, kind: input, shape index: {}]   ;;  %s3687_s6 = inlined_call_operand.vmem [shape: f32[1,256], index: 6, kind: input, shape index: {}]   ;;  %s3688_s7 = inlined_call_operand.hbm [shape: f32[16,16], index: 7, kind: input, shape index: {}]   ;;  %s3689_s8 = inlined_call_operand.vmem [shape: f32[32,16], index: 8, kind: input, shape index: {}]   ;;  %s3690_s9 = inlined_call_operand.vmem [shape: f32[32,16], index: 9, kind: input, shape index: {}]   ;;  %s3691_s10 = inlined_call_operand.vmem [shape: f32[32,128], index: 10, kind: input, shape index: {}]   ;;  %s3692_s11 = inlined_call_operand.vmem [shape: f32[32,128], index: 11, kind: input, shape index: {}]   ;;  %s3693_s12 = inlined_call_operand.vmem [shape: f32[1,128], index: 12, kind: input, shape index: {}]   ;;  %s3694_s13 = inlined_call_operand.hbm [shape: f32[2,128], index: 13, kind: output, shape index: {}]  }
   0x1   :  { %19 = vsyncpa [#allocation6], 0 }
   0x2   :  { %20 = vsyncpa [#allocation4], 0  ;;  %s3118_s25 = smov [#allocation5]  }
   0x3   :  { %s44_s26 = sshll.u32 %s3118_s25, 4  ;;  %s45_s26 = int_to_ptr.vmem [resolvable:$true] %s44_s26 }
   0x4   :  { %s3040_s27 = scalar_lea.vmem %s45_s26, 4096  ;;  %p3045_p1 = scmp.lt.s32.totalorder %s45_s26, %s45_s26 }
   0x5   :  { %p3041_p0 = scmp.ne.s32.totalorder %s45_s26, %s3040_s27  ;;  %p3046_p2 = scmp.lt.s32.totalorder %s3040_s27, %s3040_s27 }
   0x7   :  { %p3047_p3 = por %p3046_p2, %p3045_p1 }
   0x9   :  { %p3048_p4 = pnand %p3047_p3, %p3041_p0 }
   0xb   :  { %3051 = shalt.err (!%p3048_p4)
}
   0xc   :  { %s3119_s28 = smov 256   ;;  %s3120_s29 = smov 16  }
   0xd   :  { %50 = dma.hbm_to_vmem [thread:$0]  %s3686_s5, 4096, %s45_s26, [#allocation6], %s3119_s28, %s3119_s28, %s3120_s29  }
   0xe   :  { %s3121_s15 = smov [#allocation2]   ;;  %s3122_s17 = smov [#allocation7]  }
   0xf   :  { %s33_s16 = sshll.u32 %s3121_s15, 4  ;;  %s58_s18 = sshll.u32 %s3122_s17, 4  ;;  %s34_s16 = int_to_ptr.vmem [resolvable:$true] %s33_s16  ;;  %s59_s18 = int_to_ptr.vmem [resolvable:$true] %s58_s18 }
  0x10   :  { %s3060_s19 = scalar_lea.vmem %s34_s16, 48  ;;  %s3064_s20 = scalar_lea.vmem %s34_s16, 64 }
  0x11   :  { %p3061_p5 = scmp.ne.s32.totalorder %s34_s16, %s3060_s19  ;;  %p3065_p6 = scmp.lt.s32.totalorder %s34_s16, %s34_s16 }
  0x12   :  { %p3066_p7 = scmp.lt.s32.totalorder %s3064_s20, %s3060_s19 }
  0x14   :  { %p3067_p8 = por %p3066_p7, %p3065_p6 }
  0x16   :  { %p3068_p9 = pnand %p3067_p8, %p3061_p5 }
  0x18   :  { %3071 = shalt.err (!%p3068_p9)
}
  0x19   :  { %36 = dma.hbm_to_vmem [thread:$0]  %s3684_s3, 48, %s34_s16, [#allocation3]  }
  0x1a   :  { %s3080_s23 = scalar_lea.vmem %s59_s18, 256  ;;  %p3085_p11 = scmp.lt.s32.totalorder %s59_s18, %s59_s18 }
  0x1b   :  { %p3081_p10 = scmp.ne.s32.totalorder %s59_s18, %s3080_s23  ;;  %p3086_p12 = scmp.lt.s32.totalorder %s3080_s23, %s3080_s23 }
  0x1d   :  { %p3087_p13 = por %p3086_p12, %p3085_p11 }
  0x1f   :  { %p3088_p0 = pnand %p3087_p13, %p3081_p10 }
  0x21   :  { %3091 = shalt.err (!%p3088_p0)
}
  0x22   :  { %s3123_s5 = smov 128   ;;  %s3124_s24 = smov 8  }
  0x23   :  { %64 = dma.hbm_to_vmem [thread:$0]  %s3688_s7, 256, %s59_s18, [#allocation6], %s3123_s5, %s3123_s5, %s3124_s24  }
  0x24   :  { %3112 = dma.done.wait [#allocation3], 48  }
  0x25   :  { %3113 = vsyncadd [#allocation3], 4294967248 }
  0x26   :  { %3114 = dma.done.wait [#allocation6], 4352  }
  0x27   :  { %3115 = vsyncadd [#allocation6], 4294962944  ;;  %v3125_v0 = vmov 0   ;;  %vm114_vm0 = vcmask 1041408   ;;  %v3126_v1 = vmov 0.0   ;;  %v84_v2 = vld [vmem:[%s3681_s0] sm:$0xff]  ;;  %v86_v19 = vlaneseq }
  0x28   :  { %2934 = vset.pattern.permute.xlu0 %v3125_v0  ;;  %296 = vmatprep.mubr.f32.mxu1 %v3126_v1  ;;  %v106_v3 = vld [vmem:[%s3682_s1 + $0x30] sm:$0x3]  ;;  %v105_v4 = vld [vmem:[%s3682_s1 + $0x28] sm:$0xff]  ;;  %v104_v6 = vld [vmem:[%s3682_s1 + $0x20] sm:$0xff]  ;;  %vm107_vm1 = vcmask 408576   ;;  %vm225_vm4 = vcmask 326656  }
  0x29   :  { %89 = vperm.xlu0 %2934, %v84_v2   ;;  %2772 = vmatprep.subr.msk.mxu0 %vm114_vm0, %v106_v3  ;;  %v85_v5 = vld [vmem:[%s3681_s0 + $0x8] sm:$0xff]  ;;  %v205_v8 = vld [vmem:[%s3683_s2 + $0x60] sm:$0xff]  ;;  %v103_v9 = vld [vmem:[%s3682_s1 + $0x18] sm:$0xff]  ;;  %v87_v20 = vand.u32 127, %v86_v19  ;;  %v3296_v34 = vshrl.u32 %v86_v19, 7  ;;  %vm465_vm5 = vcmask 130048  }
  0x2a   :  { %2773 = vmatpush3.msk.msra.mxu0 %vm114_vm0, %v106_v3  ;;  %v206_v7 = vld [vmem:[%s3683_s2 + $0x68] sm:$0xff]  ;;  %v203_v10 = vld [vmem:[%s3683_s2 + $0x50] sm:$0xff]  ;;  %v200_v13 = vld [vmem:[%s3683_s2 + $0x38] sm:$0xff]  ;;  %s3128_s7 = smov 4   ;;  %vm940_vm6 = vcmask 1043456   ;;  %vm3133_vm7 = vmmov 0  }
  0x2b   :  { %2774 = vmatprep.subr.mxu0 %v105_v4  ;;  %254 = vmatprep.subr.mxu1 %v206_v7  ;;  %v202_v11 = vld [vmem:[%s3683_s2 + $0x48] sm:$0xff]  ;;  %v102_v12 = vld [vmem:[%s3682_s1 + $0x10] sm:$0xff]  ;;  %v197_v16 = vld [vmem:[%s3683_s2 + $0x20] sm:$0xff]  ;;  %v212_v35 = vsub.s32 0, %v3296_v34  ;;  %v216_v40 = vsub.s32 1, %v3296_v34  ;;  %v220_v42 = vsub.s32 2, %v3296_v34 }
  0x2c   :  { %2775 = vmatpush3.msra.mxu0 %v105_v4  ;;  %255 = vmatpush1.msra.mxu1 %v205_v8  ;;  %v199_v14 = vld [vmem:[%s3683_s2 + $0x30] sm:$0xff]  ;;  %v101_v15 = vld [vmem:[%s3682_s1 + $0x8] sm:$0xff]  ;;  %v196_v17 = vld [vmem:[%s3683_s2 + $0x18] sm:$0xff]  ;;  %vm937_vm8 = vcmask 31744  }
  0x2d   :  { %92 = vperm.xlu0 %2934, %v85_v5   ;;  %2776 = vmatprep.subr.mxu0 %v104_v6  ;;  %v100_v18 = vld [vmem:[%s3682_s1] sm:$0xff]  ;;  %v194_v25 = vld [vmem:[%s3683_s2 + $0x8] sm:$0xff]  ;;  %v207_v27 = vld [vmem:[%s3683_s2 + $0x70] sm:$0xff] }
  0x2e   :  { %2777 = vmatpush3.msra.mxu0 %v104_v6  ;;  %256 = vmatprep.subr.mxu1 %v203_v10  ;;  %v193_v26 = vld [vmem:[%s3683_s2] sm:$0xff]  ;;  %v204_v30 = vld [vmem:[%s3683_s2 + $0x58] sm:$0xff]  ;;  %v198_v32 = vld [vmem:[%s3683_s2 + $0x28] sm:$0xff] }
  0x2f   :  { %2778 = vmatprep.subr.mxu0 %v103_v9  ;;  %257 = vmatpush1.msra.mxu1 %v202_v11  ;;  %v201_v31 = vld [vmem:[%s3683_s2 + $0x40] sm:$0xff]  ;;  %v195_v33 = vld [vmem:[%s3683_s2 + $0x10] sm:$0xff]  ;;  %v462_v59 = vld [vmem:[%s3685_s4 + $0x8] sm:$0xff]  ;;  %s3134_s2 = smov 116  }
  0x30   :  { %2779 = vmatpush3.msra.mxu0 %v103_v9  ;;  %258 = vmatprep.subr.mxu1 %v200_v13  ;;  %v208_v36 = vld [vmem:[#allocation2] sm:$0x7]  ;;  %v600_v13 = vld [vmem:[#allocation5 + $0xe8] sm:$0xff]  ;;  %v699_v34 = vld [vmem:[%s3690_s9 + $0x18] sm:$0xff] }
  0x31   :  { %2780 = vmatprep.subr.mxu0 %v102_v12  ;;  %259 = vmatpush1.msra.mxu1 %v199_v14  ;;  %v213_v37 = vrot.slane %v208_v36, %v212_v35  ;;  %v217_v44 = vrot.slane %v208_v36, %v216_v40  ;;  %v221_v47 = vrot.slane %v208_v36, %v220_v42  ;;  %v461_v56 = vld [vmem:[%s3685_s4] sm:$0xff]  ;;  %s3135_s4 = smov [#allocation8]  }
  0x32   :  { %2781 = vmatpush3.msra.mxu0 %v102_v12  ;;  %260 = vmatprep.subr.mxu1 %v197_v16  ;;  %v602_v11 = vld [vmem:[#allocation5 + $0xf8] sm:$0xff]  ;;  %v601_v12 = vld [vmem:[#allocation5 + $0xf0] sm:$0xff]  ;;  %v599_v14 = vld [vmem:[#allocation5 + $0xe0] sm:$0xff] }
  0x33   :  { %2782 = vmatprep.subr.mxu0 %v101_v15  ;;  %261 = vmatpush1.msra.mxu1 %v196_v17  ;;  %v597_v16 = vld [vmem:[#allocation5 + $0xd0] sm:$0xff]  ;;  %v596_v17 = vld [vmem:[#allocation5 + $0xc8] sm:$0xff]  ;;  %v594_v19 = vld [vmem:[#allocation5 + $0xb8] sm:$0xff] }
  0x34   :  { %2783 = vmatpush3.msra.mxu0 %v101_v15  ;;  %262 = vmatprep.subr.mxu1 %v194_v25  ;;  %v598_v15 = vld [vmem:[#allocation5 + $0xd8] sm:$0xff]  ;;  %v588_v25 = vld [vmem:[#allocation5 + $0x88] sm:$0xff]  ;;  %v579_v36 = vld [vmem:[#allocation5 + $0x40] sm:$0xff] }
  0x35   :  { %2784 = vmatprep.subr.mxu0 %v100_v18  ;;  %263 = vmatpush1.msra.mxu1 %v193_v26  ;;  %v587_v26 = vld [vmem:[#allocation5 + $0x80] sm:$0xff] }
  0x36   :  { %2785 = vmatpush3.msra.mxu0 %v100_v18  ;;  %2789 = vmatprep.subr.mxu1 %v207_v27  ;;  %v595_v18 = vld [vmem:[#allocation5 + $0xc0] sm:$0xff] }
  0xa4   :  { %v90_v21 = vpop.permute.xlu0 %89 }
  0xa5   :  { %vm94_vm2 = vcmp.eq.s32.totalorder %v87_v20, %v90_v21  ;;  %v592_v21 = vld [vmem:[#allocation5 + $0xa8] sm:$0xff] }
  0xa6   :  { %v2644_v22 = vsel %vm94_vm2, 1.0, %v3126_v1 }
  0xa7   :  { %2786 = vmatprep.mubr.msk.f32.mxu0 %vm107_vm1, %v2644_v22  ;;  %v591_v22 = vld [vmem:[#allocation5 + $0xa0] sm:$0xff] }
  0xa8   :  { %v93_v23 = vpop.permute.xlu0 %92 }
  0xa9   :  { %vm95_vm3 = vcmp.eq.s32.totalorder %v87_v20, %v93_v23  ;;  %v593_v20 = vld [vmem:[#allocation5 + $0xb0] sm:$0xff]  ;;  %v590_v23 = vld [vmem:[#allocation5 + $0x98] sm:$0xff] }
  0xaa   :  { %v2645_v24 = vsel %vm95_vm3, 1.0, %v3126_v1 }
  0xab   :  { %2787 = vmatmul.mubr.msk.f32.vlgmr.msra.gmra.mxu0 %vm107_vm1, %v2645_v24  ;;  %v589_v24 = vld [vmem:[#allocation5 + $0x90] sm:$0xff] }
 0x16b   :  { %v2788_v28 = vpop.f32.mrf.mxu0 }
 0x16d   :  { %v184_v29 = vpop.f32.mrf.mxu0 }
 0x16e   :  { %2649 = vmatmul.mubr.msk.f32.vlgmr.msra.gmra.mxu1 %vm225_vm4, %v184_v29 }
 0x16f   :  { %2790 = vmatpush3.msra.mxu1 %v207_v27  ;;  %302 = vmatprep.mubr.f32.mxu1 %v3126_v1  ;;  %v586_v27 = vld [vmem:[#allocation5 + $0x78] sm:$0xff] }
 0x170   :  { %2791 = vmatprep.subr.mxu1 %v204_v30 }
 0x171   :  { %2792 = vmatpush3.msra.mxu1 %v204_v30  ;;  %v583_v30 = vld [vmem:[#allocation5 + $0x60] sm:$0xff] }
 0x172   :  { %2793 = vmatprep.subr.mxu1 %v201_v31  ;;  %2650 = vmatmul.mubr.msk.f32.gmra.mxu1 %vm225_vm4, %v2788_v28 }
 0x173   :  { %2794 = vmatpush3.msra.mxu1 %v201_v31  ;;  %2799 = vmatprep.mubr.msk.f32.mxu1 %vm225_vm4, %v184_v29  ;;  %v584_v29 = vld [vmem:[#allocation5 + $0x68] sm:$0xff]  ;;  %v582_v31 = vld [vmem:[#allocation5 + $0x58] sm:$0xff] }
 0x174   :  { %2795 = vmatprep.subr.mxu1 %v198_v32 }
 0x175   :  { %2796 = vmatpush3.msra.mxu1 %v198_v32  ;;  %v581_v32 = vld [vmem:[#allocation5 + $0x50] sm:$0xff] }
 0x176   :  { %2797 = vmatprep.subr.mxu1 %v195_v33 }
 0x177   :  { %2798 = vmatpush3.msra.mxu1 %v195_v33  ;;  %v580_v33 = vld [vmem:[#allocation5 + $0x48] sm:$0xff] }
 0x178   :  { %2800 = vmatmul.mubr.msk.f32.vlgmr.msra.gmra.mxu1 %vm225_vm4, %v2788_v28  ;;  %v585_v28 = vld [vmem:[#allocation5 + $0x70] sm:$0xff] }
 0x22e   :  { %v298_v38 = vpop.f32.mrf.mxu1 }
 0x22f   :  { %v299_v39 = vadd.f32 %v298_v38, %v213_v37  ;;  %v577_v38 = vld [vmem:[#allocation5 + $0x30] sm:$0xff] }
 0x230   :  { %v300_v41 = vpop.f32.mrf.mxu1 }
 0x231   :  { %2806 = vmatprep.mubr.f32.mxu0 %v299_v39  ;;  %v301_v48 = vadd.f32 %v300_v41, %v217_v44  ;;  %v576_v39 = vld [vmem:[#allocation5 + $0x28] sm:$0xff] }
 0x232   :  { %v304_v43 = vpop.f32.mrf.mxu1 }
 0x233   :  { %v305_v53 = vadd.f32 %v304_v43, %v213_v37  ;;  %v578_v37 = vld [vmem:[#allocation5 + $0x38] sm:$0xff] }
 0x234   :  { %v306_v45 = vpop.f32.mrf.mxu1 }
 0x235   :  { %v307_v46 = vadd.f32 %v306_v45, %v217_v44 }
 0x237   :  { %2802 = vmatprep.subr.mxu0 %v307_v46 }
 0x238   :  { %v2801_v49 = vpop.f32.mrf.mxu1  ;;  %2803 = vmatpush3.xpose.msra.mxu0 %v307_v46 }
 0x239   :  { %v381_v50 = vadd.f32 %v2801_v49, %v221_v47  ;;  %2804 = vmatprep.subr.mxu0 %v301_v48  ;;  %v573_v49 = vld [vmem:[#allocation5 + $0x10] sm:$0xff] }
 0x23a   :  { %v375_v51 = vpop.f32.mrf.mxu1 }
 0x23b   :  { %v376_v52 = vadd.f32 %v375_v51, %v221_v47  ;;  %2809 = vmatprep.subr.mxu1 %v381_v50  ;;  %v575_v47 = vld [vmem:[#allocation5 + $0x20] sm:$0xff] }
 0x23c   :  { %2810 = vmatpush3.msra.mxu1 %v381_v50  ;;  %2805 = vmatpush3.xpose.msra.mxu0 %v301_v48  ;;  %v574_v48 = vld [vmem:[#allocation5 + $0x18] sm:$0xff]  ;;  %v572_v50 = vld [vmem:[#allocation5 + $0x8] sm:$0xff]  ;;  %v571_v51 = vld [vmem:[#allocation5] sm:$0xff] }
 0x23d   :  { %2811 = vmatprep.subr.mxu1 %v376_v52  ;;  %615 = vmatprep.subr.mxu0 %v602_v11 }
 0x23e   :  { %2812 = vmatpush3.msra.mxu1 %v376_v52 }
 0x23f   :  { %2807 = vmatmul.mubr.f32.vlgmr.msra.gmra.mxu0 %v305_v53 }
 0x240   :  { %679 = vmatprep.mubr.f32.mxu0 %v3126_v1  ;;  %616 = vmatpush1.msra.mxu0 %v601_v12 }
 0x241   :  { %617 = vmatprep.subr.mxu0 %v600_v13  ;;  %v3374_v13 = vld [vmem:[#allocation7 + $0x8] sm:$0xf] }
 0x242   :  { %618 = vmatpush1.msra.mxu0 %v599_v14 }
 0x243   :  { %619 = vmatprep.subr.mxu0 %v598_v15 }
 0x244   :  { %620 = vmatpush1.msra.mxu0 %v597_v16  ;;  %v901_v16 = vmul.f32 0.0, %v3374_v13 }
 0x245   :  { %621 = vmatprep.subr.mxu0 %v596_v17 }
 0x246   :  { %622 = vmatpush1.msra.mxu0 %v595_v18  ;;  %v3377_v18 = vld [vmem:[#allocation7 + $0xc] sm:$0xf] }
 0x247   :  { %623 = vmatprep.subr.mxu0 %v594_v19 }
 0x248   :  { %624 = vmatpush1.msra.mxu0 %v593_v20 }
 0x249   :  { %625 = vmatprep.subr.mxu0 %v592_v21  ;;  %v903_v21 = vmul.f32 0.0, %v3377_v18 }
 0x24a   :  { %626 = vmatpush1.msra.mxu0 %v591_v22 }
 0x24b   :  { %627 = vmatprep.subr.mxu0 %v590_v23 }
 0x24c   :  { %628 = vmatpush1.msra.mxu0 %v589_v24 }
 0x24d   :  { %629 = vmatprep.subr.mxu0 %v588_v25 }
 0x24e   :  { %630 = vmatpush1.msra.mxu0 %v587_v26 }
 0x24f   :  { %631 = vmatprep.subr.mxu0 %v586_v27 }
 0x250   :  { %632 = vmatpush1.msra.mxu0 %v585_v28 }
 0x251   :  { %633 = vmatprep.subr.mxu0 %v584_v29 }
 0x252   :  { %634 = vmatpush1.msra.mxu0 %v583_v30 }
 0x253   :  { %635 = vmatprep.subr.mxu0 %v582_v31 }
 0x254   :  { %636 = vmatpush1.msra.mxu0 %v581_v32 }
 0x255   :  { %637 = vmatprep.subr.mxu0 %v580_v33 }
 0x256   :  { %638 = vmatpush1.msra.mxu0 %v579_v36 }
 0x257   :  { %639 = vmatprep.subr.mxu0 %v578_v37 }
 0x258   :  { %640 = vmatpush1.msra.mxu0 %v577_v38 }
 0x259   :  { %641 = vmatprep.subr.mxu0 %v576_v39 }
 0x25a   :  { %642 = vmatpush1.msra.mxu0 %v575_v47 }
 0x25b   :  { %643 = vmatprep.subr.mxu0 %v574_v48 }
 0x25c   :  { %644 = vmatpush1.msra.mxu0 %v573_v49  ;;  %v3131_v49 = vmov 14  }
 0x25d   :  { %645 = vmatprep.subr.mxu0 %v572_v50  ;;  %v3132_v50 = vmov 15  }
 0x25e   :  { %646 = vmatpush1.msra.mxu0 %v571_v51 }
 0x25f   :  { %2861 = vmatprep.subr.mxu0 %v3126_v1 }
 0x2ff   :  { %v2808_v54 = vpop.f32.mrf.mxu0 }
 0x300   :  { %v460_v57 = vmul.f32 0.15811388, %v2808_v54 }
 0x301   :  { %v450_v55 = vpop.f32.mrf.mxu0 }
 0x302   :  { %v459_v58 = vmul.f32 0.15811388, %v450_v55  ;;  %v464_v62 = vadd.f32 %v462_v59, %v460_v57  ;;  %v603_v59 = vld [vmem:[%s3687_s6] sm:$0x3] }
 0x304   :  { %v463_v60 = vadd.f32 %v461_v56, %v459_v58  ;;  %v469_v63 = vsel %vm465_vm5, %v464_v62, -inf  ;;  %v696_v56 = vld [vmem:[%s3690_s9] sm:$0xff] }
 0x306   :  { %v466_v61 = vsel %vm465_vm5, %v463_v60, -inf }
 0x307   :  { %467 = vmax.xlane.f32.xlu1 %v466_v61  ;;  %v612_v61 = vrot.slane %v603_v59, %v216_v40 }
 0x30b   :  { %470 = vmax.xlane.f32.xlu1 %v469_v63 }
 0x390   :  { %v468_v0 = vpop.xlane.xlu1 %467 }
 0x391   :  { %v472_v2 = vsub.f32 %v463_v60, %v468_v0  ;;  %v608_v0 = vrot.slane %v603_v59, %v212_v35  ;;  %v692_v35 = vld [vmem:[%s3689_s8] sm:$0xff] }
 0x393   :  { %v474_v3 = vmul.f32 1.442695, %v472_v2 }
 0x394   :  { %v471_v4 = vpop.xlane.xlu1 %470 }
 0x395   :  { %2960 = vpow2.f32 %v474_v3  ;;  %v473_v5 = vsub.f32 %v464_v62, %v471_v4  ;;  %v697_v3 = vld [vmem:[%s3690_s9 + $0x8] sm:$0xff] }
 0x397   :  { %v476_v6 = vmul.f32 1.442695, %v473_v5  ;;  %v698_v5 = vld [vmem:[%s3690_s9 + $0x10] sm:$0xff] }
 0x399   :  { %2962 = vpow2.f32 %v476_v6  ;;  %v693_v6 = vld [vmem:[%s3689_s8 + $0x8] sm:$0xff] }
 0x3a2   :  { %v3314_v7 = vpop.eup %2960 }
 0x3a3   :  { %v478_v8 = vsel %vm465_vm5, %v3314_v7, 0.0 }
 0x3a4   :  { %479 = vadd.xlane.f32.xlu0 %v478_v8  ;;  %v695_v8 = vld [vmem:[%s3689_s8 + $0x18] sm:$0xff] }
 0x3a6   :  { %v3318_v9 = vpop.eup %2962 }
 0x3a7   :  { %v481_v10 = vsel %vm465_vm5, %v3318_v9, 0.0 }
 0x3a8   :  { %482 = vadd.xlane.f32.xlu1 %v481_v10  ;;  %v3370_v10 = vld [vmem:[#allocation7 + $0x4] sm:$0xf] }
 0x3a9   :  { %v899_v12 = vmul.f32 0.0, %v3370_v10 }
 0x42d   :  { %v480_v41 = vpop.xlane.xlu0 %479 }
 0x42e   :  { %2964 = vrcp.f32 %v480_v41 }
 0x431   :  { %v483_v42 = vpop.xlane.xlu1 %482 }
 0x432   :  { %2966 = vrcp.f32 %v483_v42 }
 0x43b   :  { %v2965_v43 = vpop.eup %2964 }
 0x43c   :  { %v485_v44 = vmul.f32 %v2965_v43, %v3314_v7  ;;  %v694_v7 = vld [vmem:[%s3689_s8 + $0x10] sm:$0xff]  ;;  %s3127_s8 = smov 120  }
 0x43e   :  { %2813 = vmatprep.mubr.msk.f32.mxu1 %vm465_vm5, %v485_v44  ;;  %v3129_v44 = vmov 12  }
 0x43f   :  { %v2967_v45 = vpop.eup %2966  ;;  %2935 = vset.pattern.permute.xlu1 %v3129_v44 }
 0x440   :  { %v487_v46 = vmul.f32 %v2967_v45, %v3318_v9  ;;  %v3368_v9 = vld [vmem:[#allocation7] sm:$0xf]  ;;  %v3130_v45 = vmov 13  }
 0x441   :  { %v898_v11 = vmul.f32 0.0, %v3368_v9  ;;  %2936 = vset.pattern.permute.xlu0 %v3130_v45 }
 0x442   :  { %2814 = vmatmul.mubr.msk.f32.vlgmr.msra.gmra.mxu1 %vm465_vm5, %v487_v46 }
 0x443   :  { %2820 = vmatprep.mubr.msk.f32.mxu1 %vm465_vm5, %v696_v56  ;;  %v900_v15 = vadd.f32 %v899_v12, %v898_v11 }
 0x445   :  { %v902_v20 = vadd.f32 %v901_v16, %v900_v15 }
 0x447   :  { %v904_v25 = vadd.f32 %v903_v21, %v902_v20  ;;  %v3424_v20 = vrot.slane %v3374_v13, 4 }
 0x502   :  { %v2815_v52 = vpop.f32.mrf.mxu1 }
 0x503   :  { %v570_v55 = vmax.f32 %v2815_v52, 0.0 }
 0x504   :  { %v560_v53 = vpop.f32.mrf.mxu1 }
 0x505   :  { %v569_v54 = vmax.f32 %v560_v53, 0.0 }
 0x507   :  { %680 = vmatmul.mubr.f32.vlgmr.msra.gmra.mxu0 %v569_v54 }
 0x508   :  { %685 = vmatprep.mubr.f32.mxu0 %v3126_v1 }
 0x50b   :  { %686 = vmatmul.mubr.f32.gmra.mxu0 %v570_v55 }
 0x50c   :  { %2863 = vmatprep.mubr.msk.f32.mxu0 %vm3133_vm7, %v3126_v1 }
 0x5c7   :  { %v681_v57 = vpop.f32.mrf.mxu0 }
 0x5c8   :  { %v682_v40 = vadd.f32 %v681_v57, %v608_v0 }
 0x5c9   :  { %v683_v58 = vpop.f32.mrf.mxu0 }
 0x5ca   :  { %v684_v2 = vadd.f32 %v683_v58, %v612_v61 }
 0x5cb   :  { %v687_v60 = vpop.f32.mrf.mxu0 }
 0x5cc   :  { %v688_v4 = vadd.f32 %v687_v60, %v608_v0 }
 0x5cd   :  { %v689_v62 = vpop.f32.mrf.mxu0 }
 0x5ce   :  { %v690_v63 = vadd.f32 %v689_v62, %v612_v61 }
 0x5d0   :  { %2816 = vmatprep.subr.mxu1 %v690_v63 }
 0x5d1   :  { %2817 = vmatpush3.msra.mxu1 %v690_v63 }
 0x5d2   :  { %2818 = vmatprep.subr.mxu1 %v684_v2 }
 0x5d3   :  { %2819 = vmatpush3.msra.mxu1 %v684_v2 }
 0x5d4   :  { %2821 = vmatmul.mubr.msk.f32.vlgmr.msra.gmra.mxu1 %vm465_vm5, %v697_v3  ;;  %2826 = vmatprep.subr.mxu1 %v688_v4 }
 0x5d5   :  { %2827 = vmatpush3.msra.mxu1 %v688_v4  ;;  %2823 = vmatprep.mubr.msk.f32.mxu1 %vm465_vm5, %v698_v5 }
 0x5d6   :  { %2828 = vmatprep.subr.mxu1 %v682_v40 }
 0x5d7   :  { %2829 = vmatpush3.msra.mxu1 %v682_v40 }
 0x5d8   :  { %2824 = vmatmul.mubr.msk.f32.gmra.mxu1 %vm465_vm5, %v699_v34  ;;  %2836 = vmatprep.subr.mxu1 %v3126_v1 }
 0x5d9   :  { %2830 = vmatprep.mubr.msk.f32.mxu1 %vm465_vm5, %v692_v35 }
 0x5dc   :  { %2831 = vmatmul.mubr.msk.f32.vlgmr.msra.gmra.mxu1 %vm465_vm5, %v693_v6 }
 0x5dd   :  { %2833 = vmatprep.mubr.msk.f32.mxu1 %vm465_vm5, %v694_v7 }
 0x5e0   :  { %2834 = vmatmul.mubr.msk.f32.gmra.mxu1 %vm465_vm5, %v695_v8 }
 0x5e1   :  { %2838 = vmatprep.mubr.msk.f32.mxu1 %vm3133_vm7, %v3126_v1 }
 0x694   :  { %v2822_v14 = vpop.f32.mrf.mxu1 }
 0x696   :  { %v778_v17 = vpop.f32.mrf.mxu1 }
 0x698   :  { %v2825_v19 = vpop.f32.mrf.mxu1 }
 0x69a   :  { %v3380_v22 = vpop.f32.mrf.mxu1 }
 0x69c   :  { %v2832_v23 = vpop.f32.mrf.mxu1 }
 0x69d   :  { %v3382_v24 = vadd.f32 %v2832_v23, %v2822_v14 }
 0x69e   :  { %v875_v26 = vpop.f32.mrf.mxu1 }
 0x69f   :  { %v876_v27 = vadd.f32 %v875_v26, %v778_v17  ;;  %v3418_v17 = vrot.slane %v3370_v10, 4 }
 0x6a0   :  { %v2835_v28 = vpop.f32.mrf.mxu1 }
 0x6a1   :  { %v905_v29 = vadd.f32 %v904_v25, %v876_v27  ;;  %v3384_v30 = vadd.f32 %v2835_v28, %v2825_v19  ;;  %v3421_v19 = vrot.slane %v3368_v9, 4 }
 0x6a3   :  { %2968 = vtanh.f32 %v905_v29  ;;  %v2663_v32 = vmul.f32 -1.442695, %v905_v29 }
 0x6a5   :  { %2970 = vpow2.f32 %v2663_v32 }
 0x6b0   :  { %v2969_v31 = vpop.eup %2968 }
 0x6b1   :  { %915 = vrot.lane.b32.xlu1 %v2969_v31, %s3127_s8 }
 0x6b2   :  { %v2971_v33 = vpop.eup %2970 }
 0x6b3   :  { %v909_v36 = vadd.f32 1.0, %v2971_v33 }
 0x6b5   :  { %2972 = vrcp.f32 %v909_v36 }
 0x6c2   :  { %v2973_v37 = vpop.eup %2972 }
 0x6c3   :  { %v913_v41 = vmul.f32 0.0, %v2973_v37 }
 0x723   :  { %v916_v38 = vpop.permute.xlu1 %915 }
 0x724   :  { %v918_v39 = vmul.f32 %v2973_v37, %v916_v38 }
 0x726   :  { %920 = vrot.lane.b32.xlu1 %v918_v39, %s3128_s7 }
 0x798   :  { %v921_v42 = vpop.permute.xlu1 %920 }
 0x799   :  { %v923_v43 = vadd.f32 %v921_v42, %v913_v41 }
 0x79b   :  { %2974 = vtanh.f32 %v923_v43  ;;  %v1127_v35 = vrot.slane %v923_v43, 4 }
 0x7a8   :  { %v2975_v46 = vpop.eup %2974 }
 0x7a9   :  { %926 = vrot.lane.b32.xlu1 %v2975_v46, %s3124_s24 }
 0x81b   :  { %v927_v47 = vpop.permute.xlu1 %926 }
 0x81c   :  { %v3391_v48 = vmul.f32 %v2973_v37, %v927_v47 }
 0x81e   :  { %1098 = vperm.xlu0 %2936, %v3391_v48   ;;  %1093 = vperm.xlu1 %2935, %v3391_v48  }
 0x822   :  { %2937 = vset.pattern.permute.xlu1 %v3131_v49 }
 0x823   :  { %1104 = vperm.xlu1 %2937, %v3391_v48  }
 0x827   :  { %2938 = vset.pattern.permute.xlu1 %v3132_v50 }
 0x828   :  { %1110 = vperm.xlu1 %2938, %v3391_v48  }
 0x82c   :  { %2939 = vset.pattern.permute.xlu1 %v3129_v44 }
 0x899   :  { %v1094_v51 = vpop.permute.xlu1 %1093  ;;  %v1099_v52 = vpop.permute.xlu0 %1098 }
 0x89a   :  { %v1101_v53 = vmul.f32 %v1099_v52, %v3370_v10  ;;  %v1096_v54 = vmul.f32 %v1094_v51, %v3368_v9 }
 0x89c   :  { %v1102_v57 = vadd.f32 %v1101_v53, %v1096_v54 }
 0x89e   :  { %v1105_v55 = vpop.permute.xlu1 %1104 }
 0x89f   :  { %v1107_v56 = vmul.f32 %v1105_v55, %v3374_v13 }
 0x8a1   :  { %v1108_v59 = vadd.f32 %v1107_v56, %v1102_v57 }
 0x8a3   :  { %v1111_v58 = vpop.permute.xlu1 %1110 }
 0x8a4   :  { %v1113_v60 = vmul.f32 %v1111_v58, %v3377_v18 }
 0x8a6   :  { %v1114_v61 = vadd.f32 %v1113_v60, %v1108_v59 }
 0x8a8   :  { %v1116_v62 = vrot.slane %v1114_v61, 4 }
 0x8aa   :  { %v1118_v63 = vadd.f32 %v1116_v62, %v876_v27  ;;  %v3430_v27 = vrot.slane %v3377_v18, 4 }
 0x8ac   :  { %2976 = vtanh.f32 %v1118_v63  ;;  %v2668_v2 = vmul.f32 -1.442695, %v1118_v63 }
 0x8ae   :  { %2978 = vpow2.f32 %v2668_v2 }
 0x8b9   :  { %v2977_v0 = vpop.eup %2976 }
 0x8ba   :  { %1131 = vrot.lane.b32.xlu1 %v2977_v0, %s3127_s8 }
 0x8bb   :  { %v2979_v3 = vpop.eup %2978 }
 0x8bc   :  { %v1122_v4 = vadd.f32 1.0, %v2979_v3 }
 0x8be   :  { %2980 = vrcp.f32 %v1122_v4 }
 0x8cb   :  { %v2981_v5 = vpop.eup %2980 }
 0x8cc   :  { %v1129_v6 = vmul.f32 %v2981_v5, %v1127_v35 }
 0x92c   :  { %v1132_v40 = vpop.permute.xlu1 %1131 }
 0x92d   :  { %v1134_v34 = vmul.f32 %v2981_v5, %v1132_v40 }
 0x92f   :  { %1136 = vrot.lane.b32.xlu1 %v1134_v34, %s3128_s7 }
 0x9a1   :  { %v1137_v7 = vpop.permute.xlu1 %1136 }
 0x9a2   :  { %v1139_v8 = vadd.f32 %v1137_v7, %v1129_v6 }
 0x9a4   :  { %2982 = vtanh.f32 %v1139_v8  ;;  %v1356_v51 = vrot.slane %v1139_v8, 4 }
 0x9b1   :  { %v2983_v11 = vpop.eup %2982 }
 0x9b2   :  { %1142 = vrot.lane.b32.xlu1 %v2983_v11, %s3124_s24 }
 0xa24   :  { %v1143_v12 = vpop.permute.xlu1 %1142 }
 0xa25   :  { %v3407_v14 = vmul.f32 %v2981_v5, %v1143_v12 }
 0xa27   :  { %1310 = vperm.xlu1 %2939, %v3407_v14  }
 0xa2b   :  { %2940 = vset.pattern.permute.xlu1 %v3130_v45 }
 0xa2c   :  { %1318 = vperm.xlu1 %2940, %v3407_v14  }
 0xa30   :  { %2941 = vset.pattern.permute.xlu1 %v3131_v49 }
 0xa31   :  { %1327 = vperm.xlu1 %2941, %v3407_v14  }
 0xa35   :  { %2942 = vset.pattern.permute.xlu1 %v3132_v50 }
 0xa36   :  { %1336 = vperm.xlu1 %2942, %v3407_v14  }
 0xa3a   :  { %2943 = vset.pattern.permute.xlu1 %v3129_v44 }
 0xaa2   :  { %v1311_v15 = vpop.permute.xlu1 %1310 }
 0xaa3   :  { %v1316_v25 = vmul.f32 %v3421_v19, %v1311_v15 }
 0xaa7   :  { %v1319_v16 = vpop.permute.xlu1 %1318 }
 0xaa8   :  { %v1324_v21 = vmul.f32 %v3418_v17, %v1319_v16 }
 0xaaa   :  { %v1325_v28 = vadd.f32 %v1324_v21, %v1316_v25 }
 0xaac   :  { %v1328_v23 = vpop.permute.xlu1 %1327 }
 0xaad   :  { %v1333_v26 = vmul.f32 %v3424_v20, %v1328_v23 }
 0xaaf   :  { %v1334_v31 = vadd.f32 %v1333_v26, %v1325_v28 }
 0xab1   :  { %v1337_v29 = vpop.permute.xlu1 %1336 }
 0xab2   :  { %v1342_v32 = vmul.f32 %v3430_v27, %v1337_v29 }
 0xab4   :  { %v1343_v33 = vadd.f32 %v1342_v32, %v1334_v31 }
 0xab6   :  { %v1345_v36 = vrot.slane %v1343_v33, 4 }
 0xab8   :  { %v1347_v37 = vadd.f32 %v1345_v36, %v3382_v24 }
 0xaba   :  { %2984 = vtanh.f32 %v1347_v37  ;;  %v2673_v39 = vmul.f32 -1.442695, %v1347_v37 }
 0xabc   :  { %2986 = vpow2.f32 %v2673_v39 }
 0xac7   :  { %v2985_v38 = vpop.eup %2984 }
 0xac8   :  { %1360 = vrot.lane.b32.xlu1 %v2985_v38, %s3127_s8 }
 0xac9   :  { %v2987_v41 = vpop.eup %2986 }
 0xaca   :  { %v1351_v42 = vadd.f32 1.0, %v2987_v41 }
 0xacc   :  { %2988 = vrcp.f32 %v1351_v42 }
 0xad9   :  { %v2989_v43 = vpop.eup %2988 }
 0xada   :  { %v1358_v52 = vmul.f32 %v2989_v43, %v1356_v51 }
 0xb3a   :  { %v1361_v46 = vpop.permute.xlu1 %1360 }
 0xb3b   :  { %v1363_v47 = vmul.f32 %v2989_v43, %v1361_v46 }
 0xb3d   :  { %1365 = vrot.lane.b32.xlu1 %v1363_v47, %s3128_s7 }
 0xbaf   :  { %v1366_v53 = vpop.permute.xlu1 %1365 }
 0xbb0   :  { %v1368_v54 = vadd.f32 %v1366_v53, %v1358_v52 }
 0xbb2   :  { %2990 = vtanh.f32 %v1368_v54  ;;  %v1572_v16 = vrot.slane %v1368_v54, 4 }
 0xbbf   :  { %v2991_v55 = vpop.eup %2990 }
 0xbc0   :  { %1371 = vrot.lane.b32.xlu0 %v2991_v55, %s3124_s24 }
 0xc32   :  { %v1372_v56 = vpop.permute.xlu0 %1371 }
 0xc33   :  { %v3437_v57 = vmul.f32 %v2989_v43, %v1372_v56  ;;  %v885_v43 = vpop.f32.mrf.mxu1 }
 0xc34   :  { %v886_v47 = vadd.f32 %v885_v43, %v3380_v22 }
 0xc35   :  { %1543 = vperm.xlu0 %2936, %v3437_v57   ;;  %1538 = vperm.xlu1 %2943, %v3437_v57  }
 0xc39   :  { %2945 = vset.pattern.permute.xlu0 %v3132_v50  ;;  %2944 = vset.pattern.permute.xlu1 %v3131_v49 }
 0xc3a   :  { %1555 = vperm.xlu0 %2945, %v3437_v57   ;;  %1549 = vperm.xlu1 %2944, %v3437_v57  }
 0xc3e   :  { %2947 = vset.pattern.permute.xlu0 %v3130_v45  ;;  %2946 = vset.pattern.permute.xlu1 %v3129_v44 }
 0xcb0   :  { %v1544_v58 = vpop.permute.xlu0 %1543  ;;  %v1539_v59 = vpop.permute.xlu1 %1538 }
 0xcb1   :  { %v1546_v60 = vmul.f32 %v1544_v58, %v3370_v10  ;;  %v1541_v61 = vmul.f32 %v1539_v59, %v3368_v9 }
 0xcb3   :  { %v1547_v0 = vadd.f32 %v1546_v60, %v1541_v61 }
 0xcb5   :  { %v1556_v62 = vpop.permute.xlu0 %1555  ;;  %v1550_v63 = vpop.permute.xlu1 %1549 }
 0xcb6   :  { %v1552_v2 = vmul.f32 %v1550_v63, %v3374_v13  ;;  %v1558_v3 = vmul.f32 %v1556_v62, %v3377_v18 }
 0xcb8   :  { %v1553_v4 = vadd.f32 %v1552_v2, %v1547_v0 }
 0xcba   :  { %v1559_v5 = vadd.f32 %v1558_v3, %v1553_v4 }
 0xcbc   :  { %v1561_v40 = vrot.slane %v1559_v5, 4 }
 0xcbe   :  { %v1563_v34 = vadd.f32 %v1561_v40, %v3382_v24 }
 0xcc0   :  { %2992 = vtanh.f32 %v1563_v34  ;;  %v2678_v6 = vmul.f32 -1.442695, %v1563_v34 }
 0xcc2   :  { %2994 = vpow2.f32 %v2678_v6 }
 0xccd   :  { %v2993_v35 = vpop.eup %2992 }
 0xcce   :  { %1576 = vrot.lane.b32.xlu1 %v2993_v35, %s3127_s8 }
 0xccf   :  { %v2995_v7 = vpop.eup %2994 }
 0xcd0   :  { %v1567_v8 = vadd.f32 1.0, %v2995_v7 }
 0xcd2   :  { %2996 = vrcp.f32 %v1567_v8 }
 0xcdf   :  { %v2997_v11 = vpop.eup %2996 }
 0xce0   :  { %v1574_v21 = vmul.f32 %v2997_v11, %v1572_v16 }
 0xd40   :  { %v1577_v12 = vpop.permute.xlu1 %1576 }
 0xd41   :  { %v1579_v15 = vmul.f32 %v2997_v11, %v1577_v12 }
 0xd43   :  { %1581 = vrot.lane.b32.xlu1 %v1579_v15, %s3128_s7 }
 0xdb5   :  { %v1582_v23 = vpop.permute.xlu1 %1581 }
 0xdb6   :  { %v1584_v25 = vadd.f32 %v1582_v23, %v1574_v21 }
 0xdb8   :  { %2998 = vtanh.f32 %v1584_v25  ;;  %v1789_v61 = vrot.slane %v1584_v25, 4 }
 0xdc5   :  { %v2999_v24 = vpop.eup %2998 }
 0xdc6   :  { %1587 = vrot.lane.b32.xlu0 %v2999_v24, %s3124_s24 }
 0xe38   :  { %v1588_v26 = vpop.permute.xlu0 %1587 }
 0xe39   :  { %v3455_v28 = vmul.f32 %v2997_v11, %v1588_v26 }
 0xe3b   :  { %1760 = vperm.xlu0 %2947, %v3455_v28   ;;  %1755 = vperm.xlu1 %2946, %v3455_v28  }
 0xe3f   :  { %2948 = vset.pattern.permute.xlu1 %v3131_v49 }
 0xe40   :  { %1766 = vperm.xlu1 %2948, %v3455_v28  }
 0xe44   :  { %2949 = vset.pattern.permute.xlu1 %v3132_v50 }
 0xe45   :  { %1772 = vperm.xlu1 %2949, %v3455_v28  }
 0xe49   :  { %2950 = vset.pattern.permute.xlu1 %v3129_v44 }
 0xeb6   :  { %v1756_v29 = vpop.permute.xlu1 %1755  ;;  %v1761_v31 = vpop.permute.xlu0 %1760 }
 0xeb7   :  { %v1763_v32 = vmul.f32 %v1761_v31, %v3418_v17  ;;  %v1758_v33 = vmul.f32 %v1756_v29, %v3421_v19 }
 0xeb9   :  { %v1764_v38 = vadd.f32 %v1763_v32, %v1758_v33 }
 0xebb   :  { %v1767_v36 = vpop.permute.xlu1 %1766 }
 0xebc   :  { %v1769_v37 = vmul.f32 %v1767_v36, %v3424_v20 }
 0xebe   :  { %v1770_v41 = vadd.f32 %v1769_v37, %v1764_v38 }
 0xec0   :  { %v1773_v39 = vpop.permute.xlu1 %1772 }
 0xec1   :  { %v1775_v42 = vmul.f32 %v1773_v39, %v3430_v27 }
 0xec3   :  { %v1776_v46 = vadd.f32 %v1775_v42, %v1770_v41 }
 0xec5   :  { %v1778_v51 = vrot.slane %v1776_v46, 4 }
 0xec7   :  { %v1780_v52 = vadd.f32 %v1778_v51, %v886_v47 }
 0xec9   :  { %3000 = vtanh.f32 %v1780_v52  ;;  %v2683_v54 = vmul.f32 -1.442695, %v1780_v52 }
 0xecb   :  { %3002 = vpow2.f32 %v2683_v54 }
 0xed6   :  { %v3001_v53 = vpop.eup %3000 }
 0xed7   :  { %1793 = vrot.lane.b32.xlu0 %v3001_v53, %s3127_s8 }
 0xed8   :  { %v3003_v55 = vpop.eup %3002 }
 0xed9   :  { %v1784_v56 = vadd.f32 1.0, %v3003_v55 }
 0xedb   :  { %3004 = vrcp.f32 %v1784_v56 }
 0xee8   :  { %v3005_v58 = vpop.eup %3004 }
 0xee9   :  { %v1791_v62 = vmul.f32 %v3005_v58, %v1789_v61 }
 0xf49   :  { %v1794_v59 = vpop.permute.xlu0 %1793 }
 0xf4a   :  { %v1796_v60 = vmul.f32 %v3005_v58, %v1794_v59 }
 0xf4c   :  { %1798 = vrot.lane.b32.xlu1 %v1796_v60, %s3128_s7 }
 0xfbe   :  { %v1799_v63 = vpop.permute.xlu1 %1798 }
 0xfbf   :  { %v1801_v22 = vadd.f32 %v1799_v63, %v1791_v62 }
 0xfc1   :  { %3006 = vtanh.f32 %v1801_v22  ;;  %v2005_v32 = vrot.slane %v1801_v22, 4 }
 0xfce   :  { %v3007_v0 = vpop.eup %3006 }
 0xfcf   :  { %1804 = vrot.lane.b32.xlu0 %v3007_v0, %s3124_s24 }
0x1041   :  { %v1805_v2 = vpop.permute.xlu0 %1804 }
0x1042   :  { %v3472_v3 = vmul.f32 %v3005_v58, %v1805_v2 }
0x1044   :  { %1976 = vperm.xlu0 %2947, %v3472_v3   ;;  %1971 = vperm.xlu1 %2950, %v3472_v3  }
0x1048   :  { %2952 = vset.pattern.permute.xlu0 %v3132_v50  ;;  %2951 = vset.pattern.permute.xlu1 %v3131_v49 }
0x1049   :  { %1988 = vperm.xlu0 %2952, %v3472_v3   ;;  %1982 = vperm.xlu1 %2951, %v3472_v3  }
0x104d   :  { %2954 = vset.pattern.permute.xlu0 %v3130_v45  ;;  %2953 = vset.pattern.permute.xlu1 %v3129_v44 }
0x10bf   :  { %v1977_v4 = vpop.permute.xlu0 %1976  ;;  %v1972_v5 = vpop.permute.xlu1 %1971 }
0x10c0   :  { %v1979_v40 = vmul.f32 %v1977_v4, %v3370_v10  ;;  %v1974_v34 = vmul.f32 %v1972_v5, %v3368_v9 }
0x10c2   :  { %v1980_v7 = vadd.f32 %v1979_v40, %v1974_v34 }
0x10c4   :  { %v1989_v35 = vpop.permute.xlu0 %1988  ;;  %v1983_v6 = vpop.permute.xlu1 %1982 }
0x10c5   :  { %v1985_v8 = vmul.f32 %v1983_v6, %v3374_v13  ;;  %v1991_v11 = vmul.f32 %v1989_v35, %v3377_v18 }
0x10c7   :  { %v1986_v12 = vadd.f32 %v1985_v8, %v1980_v7 }
0x10c9   :  { %v1992_v15 = vadd.f32 %v1991_v11, %v1986_v12 }
0x10cb   :  { %v1994_v16 = vrot.slane %v1992_v15, 4 }
0x10cd   :  { %v1996_v21 = vadd.f32 %v1994_v16, %v886_v47 }
0x10cf   :  { %3008 = vtanh.f32 %v1996_v21  ;;  %v2688_v23 = vmul.f32 -1.442695, %v1996_v21 }
0x10d1   :  { %3010 = vpow2.f32 %v2688_v23 }
0x10dc   :  { %v3009_v45 = vpop.eup %3008 }
0x10dd   :  { %2009 = vrot.lane.b32.xlu1 %v3009_v45, %s3127_s8 }
0x10de   :  { %v3011_v25 = vpop.eup %3010 }
0x10df   :  { %v2000_v24 = vadd.f32 1.0, %v3011_v25 }
0x10e1   :  { %3012 = vrcp.f32 %v2000_v24 }
0x10ee   :  { %v3013_v26 = vpop.eup %3012 }
0x10ef   :  { %v2007_v33 = vmul.f32 %v3013_v26, %v2005_v32 }
0x114f   :  { %v2010_v29 = vpop.permute.xlu1 %2009 }
0x1150   :  { %v2012_v31 = vmul.f32 %v3013_v26, %v2010_v29 }
0x1152   :  { %2014 = vrot.lane.b32.xlu1 %v2012_v31, %s3128_s7  ;;  %v1146_v31 = vmax.f32 %v3407_v14, 0.0 }
0x1154   :  { %v1149_v32 = vrot.slane %v1146_v31, 4 }
0x11c4   :  { %v2015_v36 = vpop.permute.xlu1 %2014 }
0x11c5   :  { %v2017_v37 = vadd.f32 %v2015_v36, %v2007_v33  ;;  %v1375_v33 = vmax.f32 %v3437_v57, 0.0  ;;  %v1591_v36 = vmax.f32 %v3455_v28, 0.0 }
0x11c7   :  { %3014 = vtanh.f32 %v2017_v37  ;;  %v2222_v22 = vrot.slane %v2017_v37, 4  ;;  %v1594_v37 = vrot.slane %v1591_v36, 4 }
0x11d4   :  { %v3015_v38 = vpop.eup %3014 }
0x11d5   :  { %2020 = vrot.lane.b32.xlu0 %v3015_v38, %s3124_s24 }
0x1247   :  { %v2021_v39 = vpop.permute.xlu0 %2020 }
0x1248   :  { %v3489_v41 = vmul.f32 %v3013_v26, %v2021_v39  ;;  %v930_v26 = vmax.f32 %v3391_v48, 0.0  ;;  %v1808_v48 = vmax.f32 %v3472_v3, 0.0  ;;  %v931_v3 = vld [vmem:[%s3691_s10] sm:$0xf] }
0x124a   :  { %2193 = vperm.xlu0 %2954, %v3489_v41   ;;  %2188 = vperm.xlu1 %2953, %v3489_v41   ;;  %v934_v29 = vrot.slane %v930_v26, 2  ;;  %v2024_v38 = vmax.f32 %v3489_v41, 0.0 }
0x124c   :  { %v2027_v14 = vrot.slane %v2024_v38, 4 }
0x124e   :  { %2955 = vset.pattern.permute.xlu1 %v3131_v49 }
0x124f   :  { %2199 = vperm.xlu1 %2955, %v3489_v41  }
0x1253   :  { %2956 = vset.pattern.permute.xlu1 %v3132_v50 }
0x1254   :  { %2205 = vperm.xlu1 %2956, %v3489_v41   ;;  %v1456_v41 = vld [vmem:[%s3692_s11 + $0x8] sm:$0xf] }
0x1255   :  { %2862 = vmatpush3.msk.msra.mxu0 %vm940_vm6, %v1456_v41 }
0x1256   :  { %2871 = vmatprep.subr.mxu0 %v3126_v1 }
0x1258   :  { %2957 = vset.pattern.permute.xlu1 %v3129_v44 }
0x12c5   :  { %v2189_v42 = vpop.permute.xlu1 %2188  ;;  %v2194_v43 = vpop.permute.xlu0 %2193 }
0x12c6   :  { %v2196_v46 = vmul.f32 %v2194_v43, %v3418_v17  ;;  %v2191_v47 = vmul.f32 %v2189_v42, %v3421_v19 }
0x12c8   :  { %v2197_v53 = vadd.f32 %v2196_v46, %v2191_v47 }
0x12ca   :  { %v2200_v51 = vpop.permute.xlu1 %2199 }
0x12cb   :  { %v2202_v52 = vmul.f32 %v2200_v51, %v3424_v20  ;;  %v1229_v51 = vrot.slane %v1146_v31, 6 }
0x12cd   :  { %v2203_v55 = vadd.f32 %v2202_v52, %v2197_v53  ;;  %v1457_v52 = vrot.slane %v1375_v33, 2  ;;  %v1674_v53 = vrot.slane %v1591_v36, 6 }
0x12cf   :  { %v2206_v54 = vpop.permute.xlu1 %2205 }
0x12d0   :  { %v2208_v56 = vmul.f32 %v2206_v54, %v3430_v27  ;;  %v1890_v54 = vrot.slane %v1808_v48, 2 }
0x12d2   :  { %v2209_v58 = vadd.f32 %v2208_v56, %v2203_v55  ;;  %v2107_v55 = vrot.slane %v2024_v38, 6 }
0x12d4   :  { %v2211_v59 = vrot.slane %v2209_v58, 4 }
0x12d6   :  { %v2213_v60 = vadd.f32 %v2211_v59, %v3384_v30 }
0x12d8   :  { %3016 = vtanh.f32 %v2213_v60  ;;  %v2693_v61 = vmul.f32 -1.442695, %v2213_v60 }
0x12da   :  { %3018 = vpow2.f32 %v2693_v61  ;;  %v1147_v61 = vld [vmem:[%s3691_s10 + $0x4] sm:$0xf] }
0x12e5   :  { %v3017_v44 = vpop.eup %3016 }
0x12e6   :  { %2226 = vrot.lane.b32.xlu0 %v3017_v44, %s3127_s8 }
0x12e7   :  { %v3019_v17 = vpop.eup %3018 }
0x12e8   :  { %v2217_v19 = vadd.f32 1.0, %v3019_v17 }
0x12ea   :  { %3020 = vrcp.f32 %v2217_v19 }
0x12f7   :  { %v3021_v62 = vpop.eup %3020 }
0x12f8   :  { %v2224_v27 = vmul.f32 %v3021_v62, %v2222_v22 }
0x1358   :  { %v2227_v20 = vpop.permute.xlu0 %2226 }
0x1359   :  { %v2229_v63 = vmul.f32 %v3021_v62, %v2227_v20  ;;  %v1228_v20 = vld [vmem:[%s3692_s11 + $0x4] sm:$0xf] }
0x135b   :  { %2231 = vrot.lane.b32.xlu1 %v2229_v63, %s3128_s7 }
0x13cd   :  { %v2232_v0 = vpop.permute.xlu1 %2231 }
0x13ce   :  { %v3505_v2 = vadd.f32 %v2232_v0, %v2224_v27  ;;  %v1673_v27 = vld [vmem:[%s3692_s11 + $0xc] sm:$0xf] }
0x13d0   :  { %3022 = vtanh.f32 %v3505_v2  ;;  %v2438_v57 = vrot.slane %v3505_v2, 4  ;;  %v1376_v2 = vld [vmem:[%s3691_s10 + $0x8] sm:$0xf] }
0x13dd   :  { %v3023_v4 = vpop.eup %3022 }
0x13de   :  { %2237 = vrot.lane.b32.xlu0 %v3023_v4, %s3124_s24 }
0x1450   :  { %v2238_v5 = vpop.permute.xlu0 %2237 }
0x1451   :  { %v3509_v40 = vmul.f32 %v3021_v62, %v2238_v5  ;;  %v1889_v5 = vld [vmem:[%s3692_s11 + $0x10] sm:$0xf] }
0x1453   :  { %2409 = vperm.xlu0 %2954, %v3509_v40   ;;  %2404 = vperm.xlu1 %2957, %v3509_v40   ;;  %v2241_v39 = vmax.f32 %v3509_v40, 0.0 }
0x1455   :  { %v2323_v56 = vrot.slane %v2241_v39, 2 }
0x1457   :  { %2959 = vset.pattern.permute.xlu0 %v3132_v50  ;;  %2958 = vset.pattern.permute.xlu1 %v3131_v49 }
0x1458   :  { %2421 = vperm.xlu0 %2959, %v3509_v40   ;;  %2415 = vperm.xlu1 %2958, %v3509_v40  }
0x14ce   :  { %v2410_v34 = vpop.permute.xlu0 %2409  ;;  %v2405_v35 = vpop.permute.xlu1 %2404 }
0x14cf   :  { %v2412_v6 = vmul.f32 %v2410_v34, %v3370_v10  ;;  %v2407_v7 = vmul.f32 %v2405_v35, %v3368_v9  ;;  %v1592_v34 = vld [vmem:[%s3691_s10 + $0xc] sm:$0xf]  ;;  %v2106_v35 = vld [vmem:[%s3692_s11 + $0x14] sm:$0xf] }
0x14d1   :  { %v2413_v12 = vadd.f32 %v2412_v6, %v2407_v7 }
0x14d3   :  { %v2422_v8 = vpop.permute.xlu0 %2421  ;;  %v2416_v11 = vpop.permute.xlu1 %2415 }
0x14d4   :  { %v2418_v15 = vmul.f32 %v2416_v11, %v3374_v13  ;;  %v2424_v16 = vmul.f32 %v2422_v8, %v3377_v18  ;;  %v932_v13 = vld [vmem:[%s3692_s11] sm:$0xf]  ;;  %v1809_v8 = vld [vmem:[%s3691_s10 + $0x10] sm:$0xf]  ;;  %v2322_v11 = vld [vmem:[%s3692_s11 + $0x18] sm:$0xf] }
0x14d5   :  { %2837 = vmatpush3.msk.msra.mxu1 %vm940_vm6, %v932_v13 }
0x14d6   :  { %v2419_v50 = vadd.f32 %v2418_v15, %v2413_v12  ;;  %2841 = vmatprep.subr.mxu1 %v3126_v1  ;;  %v2025_v15 = vld [vmem:[%s3691_s10 + $0x14] sm:$0xf] }
0x14d8   :  { %v2425_v21 = vadd.f32 %v2424_v16, %v2419_v50  ;;  %v2242_v50 = vld [vmem:[%s3691_s10 + $0x18] sm:$0xf] }
0x14da   :  { %v2427_v49 = vrot.slane %v2425_v21, 4 }
0x14dc   :  { %v2429_v45 = vadd.f32 %v2427_v49, %v3384_v30  ;;  %v2539_v49 = vld [vmem:[%s3692_s11 + $0x1c] sm:$0xf] }
0x14de   :  { %3024 = vtanh.f32 %v2429_v45  ;;  %v2698_v25 = vmul.f32 -1.442695, %v2429_v45  ;;  %v2458_v45 = vld [vmem:[%s3691_s10 + $0x1c] sm:$0xf] }
0x14e0   :  { %3026 = vpow2.f32 %v2698_v25 }
0x14eb   :  { %v3025_v23 = vpop.eup %3024 }
0x14ec   :  { %2442 = vrot.lane.b32.xlu1 %v3025_v23, %s3127_s8 }
0x14ed   :  { %v3027_v10 = vpop.eup %3026 }
0x14ee   :  { %v2433_v9 = vadd.f32 1.0, %v3027_v10 }
0x14f0   :  { %3028 = vrcp.f32 %v2433_v9 }
0x14fd   :  { %v3029_v18 = vpop.eup %3028 }
0x14fe   :  { %v2440_v28 = vmul.f32 %v3029_v18, %v2438_v57 }
0x155e   :  { %v2443_v30 = vpop.permute.xlu1 %2442 }
0x155f   :  { %v2445_v24 = vmul.f32 %v3029_v18, %v2443_v30 }
0x1561   :  { %2447 = vrot.lane.b32.xlu1 %v2445_v24, %s3128_s7 }
0x1565   :  { %935 = vrot.lane.b32.xlu1 %v934_v29, %s3134_s2 }
0x1569   :  { %1150 = vrot.lane.b32.xlu1 %v1149_v32, %s3134_s2 }
0x156d   :  { %1378 = vrot.lane.b32.xlu1 %v1375_v33, %s3134_s2 }
0x1571   :  { %1595 = vrot.lane.b32.xlu1 %v1594_v37, %s3134_s2 }
0x1575   :  { %1811 = vrot.lane.b32.xlu1 %v1808_v48, %s3134_s2 }
0x1579   :  { %2028 = vrot.lane.b32.xlu1 %v2027_v14, %s3134_s2 }
0x157d   :  { %2244 = vrot.lane.b32.xlu1 %v2241_v39, %s3134_s2 }
0x15d3   :  { %v2448_v42 = vpop.permute.xlu1 %2447 }
0x15d4   :  { %v2450_v43 = vadd.f32 %v2448_v42, %v2440_v28 }
0x15d6   :  { %3030 = vtanh.f32 %v2450_v43 }
0x15d7   :  { %v936_v46 = vpop.permute.xlu1 %935 }
0x15d8   :  { %2839 = vmatmul.mubr.msk.f32.vlgmr.msra.gmra.mxu1 %vm937_vm8, %v936_v46 }
0x15d9   :  { %2843 = vmatprep.mubr.msk.f32.mxu1 %vm3133_vm7, %v3126_v1  ;;  %2842 = vmatpush3.msk.msra.mxu1 %vm940_vm6, %v931_v3 }
0x15da   :  { %2846 = vmatprep.subr.mxu1 %v3126_v1 }
0x15db   :  { %v1151_v60 = vpop.permute.xlu1 %1150 }
0x15df   :  { %v1379_v63 = vpop.permute.xlu1 %1378 }
0x15e3   :  { %v3031_v47 = vpop.eup %3030  ;;  %v1596_v4 = vpop.permute.xlu1 %1595 }
0x15e4   :  { %2453 = vrot.lane.b32.xlu0 %v3031_v47, %s3124_s24  ;;  %s2634_s24 = sshll.u32 %s3135_s4, 4  ;;  %s2635_s24 = int_to_ptr.vmem [resolvable:$true] %s2634_s24 }
0x15e5   :  { %s3092_s18 = scalar_lea.vmem %s2635_s24, 32  ;;  %p3097_p2 = scmp.lt.s32.totalorder %s2635_s24, %s2635_s24 }
0x15e6   :  { %p3093_p1 = scmp.ne.s32.totalorder %s2635_s24, %s3092_s18  ;;  %p3098_p3 = scmp.lt.s32.totalorder %s3092_s18, %s3092_s18 }
0x15e7   :  { %v1812_v6 = vpop.permute.xlu1 %1811 }
0x15e8   :  { %1014 = vrot.lane.b32.xlu0 %v930_v26, %s3134_s2  ;;  %p3099_p4 = por %p3098_p3, %p3097_p2 }
0x15ea   :  { %p3100_p5 = pnand %p3099_p4, %p3093_p1 }
0x15eb   :  { %v2029_v16 = vpop.permute.xlu1 %2028 }
0x15ec   :  { %1230 = vrot.lane.b32.xlu0 %v1229_v51, %s3134_s2 }
0x15ef   :  { %v2245_v23 = vpop.permute.xlu1 %2244 }
0x15f0   :  { %1458 = vrot.lane.b32.xlu0 %v1457_v52, %s3134_s2 }
0x15f4   :  { %1675 = vrot.lane.b32.xlu0 %v1674_v53, %s3134_s2 }
0x15f8   :  { %1891 = vrot.lane.b32.xlu0 %v1890_v54, %s3134_s2 }
0x15fc   :  { %2108 = vrot.lane.b32.xlu0 %v2107_v55, %s3134_s2 }
0x1600   :  { %2324 = vrot.lane.b32.xlu0 %v2323_v56, %s3134_s2 }
0x1656   :  { %v2454_v58 = vpop.permute.xlu0 %2453 }
0x1657   :  { %v2456_v59 = vmul.f32 %v3029_v18, %v2454_v58 }
0x1659   :  { %v2457_v44 = vmax.f32 %v2456_v59, 0.0 }
0x165a   :  { %v1015_v17 = vpop.permute.xlu0 %1014 }
0x165b   :  { %v2460_v19 = vrot.slane %v2457_v44, 4  ;;  %v2540_v62 = vrot.slane %v2457_v44, 6  ;;  %2844 = vmatmul.mubr.msk.f32.vlgmr.msra.gmra.mxu1 %vm937_vm8, %v1015_v17 }
0x165c   :  { %2847 = vmatpush3.msk.msra.mxu1 %vm940_vm6, %v1147_v61  ;;  %2848 = vmatprep.mubr.msk.f32.mxu1 %vm3133_vm7, %v3126_v1 }
0x165d   :  { %2541 = vrot.lane.b32.xlu0 %v2540_v62, %s3134_s2  ;;  %2461 = vrot.lane.b32.xlu1 %v2460_v19, %s3134_s2 }
0x165e   :  { %v1231_v22 = vpop.permute.xlu0 %1230  ;;  %2851 = vmatprep.subr.mxu1 %v3126_v1 }
0x165f   :  { %2849 = vmatmul.mubr.msk.f32.vlgmr.msra.gmra.mxu1 %vm937_vm8, %v1151_v60 }
0x1660   :  { %2852 = vmatpush3.msk.msra.mxu1 %vm940_vm6, %v1228_v20  ;;  %2853 = vmatprep.mubr.msk.f32.mxu1 %vm3133_vm7, %v3126_v1 }
0x1661   :  { %2856 = vmatprep.subr.mxu1 %v3126_v1 }
0x1662   :  { %v1459_v0 = vpop.permute.xlu0 %1458 }
0x1663   :  { %2854 = vmatmul.mubr.msk.f32.vlgmr.msra.gmra.mxu1 %vm937_vm8, %v1231_v22  ;;  %2864 = vmatmul.mubr.msk.f32.vlgmr.msra.gmra.mxu0 %vm937_vm8, %v1459_v0 }
0x1664   :  { %2872 = vmatpush3.msk.msra.mxu0 %vm940_vm6, %v1673_v27  ;;  %2873 = vmatprep.mubr.msk.f32.mxu0 %vm3133_vm7, %v3126_v1 }
0x1665   :  { %2857 = vmatpush3.msk.msra.mxu1 %vm940_vm6, %v1376_v2  ;;  %2858 = vmatprep.mubr.msk.f32.mxu1 %vm3133_vm7, %v3126_v1  ;;  %v2703_v2 = vld [vmem:[%s3693_s12] ss:$0 sm:$0xff] }
0x1666   :  { %v1676_v40 = vpop.permute.xlu0 %1675  ;;  %2866 = vmatprep.subr.mxu1 %v3126_v1  ;;  %2881 = vmatprep.subr.mxu0 %v3126_v1 }
0x1667   :  { %2859 = vmatmul.mubr.msk.f32.vlgmr.msra.gmra.mxu1 %vm937_vm8, %v1379_v63  ;;  %2874 = vmatmul.mubr.msk.f32.vlgmr.msra.gmra.mxu0 %vm937_vm8, %v1676_v40 }
0x1668   :  { %2882 = vmatpush3.msk.msra.mxu0 %vm940_vm6, %v1889_v5  ;;  %2883 = vmatprep.mubr.msk.f32.mxu0 %vm3133_vm7, %v3126_v1 }
0x1669   :  { %2867 = vmatpush3.msk.msra.mxu1 %vm940_vm6, %v1592_v34  ;;  %2868 = vmatprep.mubr.msk.f32.mxu1 %vm3133_vm7, %v3126_v1 }
0x166a   :  { %v1892_v7 = vpop.permute.xlu0 %1891  ;;  %2876 = vmatprep.subr.mxu1 %v3126_v1  ;;  %2891 = vmatprep.subr.mxu0 %v3126_v1 }
0x166b   :  { %2869 = vmatmul.mubr.msk.f32.vlgmr.msra.gmra.mxu1 %vm937_vm8, %v1596_v4  ;;  %2884 = vmatmul.mubr.msk.f32.vlgmr.msra.gmra.mxu0 %vm937_vm8, %v1892_v7 }
0x166c   :  { %2892 = vmatpush3.msk.msra.mxu0 %vm940_vm6, %v2106_v35  ;;  %2893 = vmatprep.mubr.msk.f32.mxu0 %vm3133_vm7, %v3126_v1 }
0x166d   :  { %2877 = vmatpush3.msk.msra.mxu1 %vm940_vm6, %v1809_v8  ;;  %2878 = vmatprep.mubr.msk.f32.mxu1 %vm3133_vm7, %v3126_v1 }
0x166e   :  { %v2109_v12 = vpop.permute.xlu0 %2108  ;;  %2886 = vmatprep.subr.mxu1 %v3126_v1  ;;  %2901 = vmatprep.subr.mxu0 %v3126_v1 }
0x166f   :  { %2879 = vmatmul.mubr.msk.f32.vlgmr.msra.gmra.mxu1 %vm937_vm8, %v1812_v6  ;;  %2894 = vmatmul.mubr.msk.f32.vlgmr.msra.gmra.mxu0 %vm937_vm8, %v2109_v12 }
0x1670   :  { %2902 = vmatpush3.msk.msra.mxu0 %vm940_vm6, %v2322_v11  ;;  %2903 = vmatprep.mubr.msk.f32.mxu0 %vm3133_vm7, %v3126_v1 }
0x1671   :  { %2887 = vmatpush3.msk.msra.mxu1 %vm940_vm6, %v2025_v15  ;;  %2888 = vmatprep.mubr.msk.f32.mxu1 %vm3133_vm7, %v3126_v1 }
0x1672   :  { %v2325_v21 = vpop.permute.xlu0 %2324  ;;  %2896 = vmatprep.subr.mxu1 %v3126_v1  ;;  %2911 = vmatprep.subr.mxu0 %v3126_v1 }
0x1673   :  { %2889 = vmatmul.mubr.msk.f32.vlgmr.msra.gmra.mxu1 %vm937_vm8, %v2029_v16  ;;  %2904 = vmatmul.mubr.msk.f32.vlgmr.msra.gmra.mxu0 %vm937_vm8, %v2325_v21 }
0x1674   :  { %2897 = vmatpush3.msk.msra.mxu1 %vm940_vm6, %v2242_v50  ;;  %2898 = vmatprep.mubr.msk.f32.mxu1 %vm3133_vm7, %v3126_v1 }
0x1675   :  { %2906 = vmatprep.subr.mxu1 %v3126_v1  ;;  %2912 = vmatpush3.msk.msra.mxu0 %vm940_vm6, %v2539_v49 }
0x1676   :  { %2913 = vmatprep.mubr.msk.f32.mxu0 %vm3133_vm7, %v3126_v1 }
0x1677   :  { %2899 = vmatmul.mubr.msk.f32.vlgmr.msra.gmra.mxu1 %vm937_vm8, %v2245_v23 }
0x1678   :  { %2907 = vmatpush3.msk.msra.mxu1 %vm940_vm6, %v2458_v45  ;;  %2908 = vmatprep.mubr.msk.f32.mxu1 %vm3133_vm7, %v3126_v1 }
0x1698   :  { %v1010_v25 = vpop.f32.mrf.mxu1 }
0x169a   :  { %v2840_v10 = vpop.f32.mrf.mxu1 }
0x16cf   :  { %v2542_v9 = vpop.permute.xlu0 %2541  ;;  %v2462_v13 = vpop.permute.xlu1 %2461 }
0x16d0   :  { %2909 = vmatmul.mubr.msk.f32.vlgmr.msra.gmra.mxu1 %vm937_vm8, %v2462_v13  ;;  %2914 = vmatmul.mubr.msk.f32.vlgmr.msra.gmra.mxu0 %vm937_vm8, %v2542_v9 }
0x171b   :  { %v1087_v18 = vpop.f32.mrf.mxu1 }
0x171c   :  { %v1088_v24 = vadd.f32 %v1087_v18, %v1010_v25 }
0x171d   :  { %v2845_v30 = vpop.f32.mrf.mxu1 }
0x171f   :  { %v1223_v26 = vpop.f32.mrf.mxu1 }
0x1720   :  { %v1227_v29 = vadd.f32 %v1223_v26, %v1088_v24 }
0x1721   :  { %v2850_v31 = vpop.f32.mrf.mxu1 }
0x1723   :  { %v1303_v32 = vpop.f32.mrf.mxu1  ;;  %v1531_v33 = vpop.f32.mrf.mxu0 }
0x1724   :  { %v1307_v36 = vadd.f32 %v1303_v32, %v1227_v29 }
0x1725   :  { %v2855_v37 = vpop.f32.mrf.mxu1  ;;  %v2865_v48 = vpop.f32.mrf.mxu0 }
0x1727   :  { %v1451_v1 = vpop.f32.mrf.mxu1  ;;  %v1748_v38 = vpop.f32.mrf.mxu0 }
0x1728   :  { %v1455_v14 = vadd.f32 %v1451_v1, %v1307_v36 }
0x1729   :  { %v2860_v39 = vpop.f32.mrf.mxu1  ;;  %v2875_v57 = vpop.f32.mrf.mxu0 }
0x172a   :  { %v1535_v28 = vadd.f32 %v1531_v33, %v1455_v14 }
0x172b   :  { %v1668_v42 = vpop.f32.mrf.mxu1  ;;  %v1964_v43 = vpop.f32.mrf.mxu0 }
0x172c   :  { %v1672_v46 = vadd.f32 %v1668_v42, %v1535_v28 }
0x172d   :  { %v2870_v3 = vpop.f32.mrf.mxu1  ;;  %v2885_v41 = vpop.f32.mrf.mxu0 }
0x172e   :  { %v1752_v47 = vadd.f32 %v1748_v38, %v1672_v46 }
0x172f   :  { %v1884_v51 = vpop.f32.mrf.mxu1  ;;  %v2181_v52 = vpop.f32.mrf.mxu0 }
0x1730   :  { %v1888_v53 = vadd.f32 %v1884_v51, %v1752_v47 }
0x1731   :  { %v2880_v54 = vpop.f32.mrf.mxu1  ;;  %v2895_v55 = vpop.f32.mrf.mxu0 }
0x1732   :  { %v1968_v56 = vadd.f32 %v1964_v43, %v1888_v53 }
0x1733   :  { %v2101_v58 = vpop.f32.mrf.mxu1  ;;  %v2397_v59 = vpop.f32.mrf.mxu0 }
0x1734   :  { %v2105_v60 = vadd.f32 %v2101_v58, %v1968_v56 }
0x1735   :  { %v2890_v44 = vpop.f32.mrf.mxu1  ;;  %v2905_v61 = vpop.f32.mrf.mxu0 }
0x1736   :  { %v2185_v17 = vadd.f32 %v2181_v52, %v2105_v60 }
0x1737   :  { %v2317_v19 = vpop.f32.mrf.mxu1 }
0x1738   :  { %v2321_v62 = vadd.f32 %v2317_v19, %v2185_v17 }
0x1739   :  { %v2900_v20 = vpop.f32.mrf.mxu1 }
0x173a   :  { %v2401_v63 = vadd.f32 %v2397_v59, %v2321_v62 }
0x1790   :  { %v2534_v22 = vpop.f32.mrf.mxu1  ;;  %v2614_v27 = vpop.f32.mrf.mxu0 }
0x1791   :  { %v2538_v0 = vadd.f32 %v2534_v22, %v2401_v63 }
0x1792   :  { %v2910_v4 = vpop.f32.mrf.mxu1  ;;  %v2915_v5 = vpop.f32.mrf.mxu0 }
0x1793   :  { %v2618_v40 = vadd.f32 %v2614_v27, %v2538_v0 }
0x1795   :  { %v2626_v34 = vadd.f32 %v2703_v2, %v2618_v40 }
0x1797   :  { %2627 = vst [vmem:[#allocation8] sm:$0x3] %v2626_v34 }
0x1798   :  { %3103 = shalt.err (!%p3100_p5)
}
0x1799   :  { %2637 = dma.vmem_to_hbm [thread:$0]  %s2635_s24, 32, %s3694_s13, [#allocation4]  }
0x179a   :  { %3116 = dma.done.wait [#allocation4], 32  }
0x179b   :  { %3117 = vsyncadd [#allocation4], 4294967264 }
0x179c   :  { %2641 = vsyncpa [#allocation3], 1 }
0x179d   :  { %2642 = vsyncpa [#allocation6], 1 }
0x179e   :  { %2643 = vsyncpa [#allocation4], 1 }

</bundles_post_ra>
